<compile_context>
chip_gen: v7x
topology: tpu7x:2x2x1
jax: 0.10.0
libtpu: 0.0.40
codegen_flags: <defaults>
</compile_context>

<pallas_src>
import functools

import jax
import jax.numpy as jnp
from jax.experimental import pallas as pl
from jax.experimental.pallas import tpu as pltpu


def _make_textcnn_kernel(filter_windows, BB, S, V, M):
    """Builds the fused TextCNN forward kernel for one batch block of BB rows."""

    def kernel(ids_ref, table_ref, wconv_ref, bconv_ref, lin_w_ref, lin_b_ref,
               out_ref):
        # ---- Embedding lookup as a one-hot MXU matmul (table resident in VMEM).
        ids_col = ids_ref[...]                                      # (BB*S, 1) int32
        onehot = (ids_col == jax.lax.broadcasted_iota(
            jnp.int32, (BB * S, V), 1)).astype(table_ref.dtype)     # (BB*S, V)
        emb = jnp.dot(onehot, table_ref[...],
                      preferred_element_type=jnp.float32)           # (BB*S, D)

        # ---- Every conv tap of every filter window in ONE MXU matmul.
        # wconv columns are [fs0:tap0 | fs0:tap1 | ... | fs1:tap0 | ...],
        # each tap an M-wide block.
        y = jnp.dot(emb, wconv_ref[...],
                    preferred_element_type=jnp.float32)             # (BB*S, sum(fs)*M)
        y3 = y.reshape(BB, S, y.shape[-1])                          # (BB, S, sum(fs)*M)

        b_all = bconv_ref[...]                                      # (1, n_f*M)
        feats = []
        col = 0
        for fi, fs in enumerate(filter_windows):
            T = S - fs + 1                                          # valid conv positions
            acc = None
            for j in range(fs):
                tap = y3[:, j:j + T, (col + j) * M:(col + j + 1) * M]   # (BB, T, M)
                acc = tap if acc is None else acc + tap
            col += fs
            bias = b_all[:, fi * M:(fi + 1) * M][None, :, :]        # (1, 1, M)
            act = jnp.maximum(acc + bias, 0.0)                      # ReLU(conv + b)
            # TODO(synk): nn.Dropout(0.2) is the identity at inference; the
            # training-mode random mask + 1/(1-p) rescale is not implemented.
            feats.append(jnp.max(act, axis=1))                      # max-over-time (BB, M)

        cat = jnp.concatenate(feats, axis=-1)                       # (BB, n_f*M)
        logits = jnp.dot(cat, lin_w_ref[...],
                         preferred_element_type=jnp.float32) + lin_b_ref[...]
        out_ref[...] = logits.astype(out_ref.dtype)

    return kernel


def textcnn_forward(ids, table, conv_weights, conv_biases, lin_w, lin_b,
                    *, filter_windows=(3, 4, 5), batch_block=8):
    """Fused TextCNN forward: returns (B, tasks) logits.

    ids:          (B, S) int token ids (S == max_length)
    table:        (V, D) embedding table
    conv_weights: list of (fs, D, M); W[j, d, m] == torch_conv.weight[m, 0, j, d]
    conv_biases:  list of (M,)
    lin_w:        (n_f * M, tasks);  lin_b: (tasks,)
    """
    B, S = ids.shape
    V, D = table.shape
    M = conv_weights[0].shape[-1]
    n_f = len(filter_windows)
    tasks = lin_w.shape[-1]
    assert lin_w.shape[0] == n_f * M
    assert S >= max(filter_windows)

    # Guard against out-of-range token ids (review correctness concern).
    ids = jnp.clip(ids.astype(jnp.int32), 0, V - 1)

    BB = batch_block
    B_pad = pl.cdiv(B, BB) * BB
    if B_pad != B:
        ids = jnp.pad(ids, ((0, B_pad - B), (0, 0)))
    ids_col = ids.reshape(B_pad * S, 1)                     # token ids as a column

    # Stack every conv tap into one (D, sum(fs)*M) matrix and biases to (1, n_f*M).
    w_all = jnp.concatenate(
        [jnp.transpose(w, (1, 0, 2)).reshape(D, fs * M)
         for fs, w in zip(filter_windows, conv_weights)], axis=1)
    b_all = jnp.concatenate([b.reshape(1, M) for b in conv_biases], axis=1)
    lin_b2d = lin_b.reshape(1, tasks)

    kernel = _make_textcnn_kernel(tuple(filter_windows), BB, S, V, M)

    out = pl.pallas_call(
        kernel,
        out_shape=jax.ShapeDtypeStruct((B_pad, tasks), jnp.float32),
        grid=(B_pad // BB,),
        in_specs=[
            pl.BlockSpec((BB * S, 1), lambda i: (i, 0)),            # token ids (column)
            pl.BlockSpec((V, D), lambda i: (0, 0)),                 # embedding table (resident)
            pl.BlockSpec((D, w_all.shape[1]), lambda i: (0, 0)),    # fused conv weights
            pl.BlockSpec((1, n_f * M), lambda i: (0, 0)),           # conv biases
            pl.BlockSpec((n_f * M, tasks), lambda i: (0, 0)),       # linear weight
            pl.BlockSpec((1, tasks), lambda i: (0, 0)),             # linear bias
        ],
        out_specs=pl.BlockSpec((BB, tasks), lambda i: (i, 0)),
        compiler_params=pltpu.CompilerParams(
            dimension_semantics=("parallel",),     # v7x: shard batch blocks over 2 TCs
            vmem_limit_bytes=32 * 1024 * 1024),
    )(ids_col, table, w_all, b_all, lin_w, lin_b2d)

    # TODO(synk): for vocabularies too large for VMEM, fall back to a
    # scalar-prefetch row-gather of the embedding instead of the resident table.
    return out[:B]


def textcnn_reference(ids, table, conv_weights, conv_biases, lin_w, lin_b,
                      filter_windows=(3, 4, 5)):
    """Pure-JAX reference mirroring the PyTorch module (eval mode)."""
    emb = jnp.take(table, ids, axis=0)                       # (B, S, D)
    x = emb[:, None, :, :]                                   # (B, 1, S, D)
    feats = []
    for fs, w, b in zip(filter_windows, conv_weights, conv_biases):
        k = jnp.transpose(w, (2, 0, 1))[:, None, :, :]       # (M, 1, fs, D)
        y = jax.lax.conv_general_dilated(
            x, k, window_strides=(1, 1), padding="VALID",
            dimension_numbers=("NCHW", "OIHW", "NCHW"))       # (B, M, T, 1)
        y = jax.nn.relu(y + b[None, :, None, None])
        feats.append(jnp.max(y, axis=(2, 3)))                 # (B, M)
    cat = jnp.concatenate(feats, axis=-1)                     # (B, n_f*M)
    return cat @ lin_w + lin_b[None, :]


if __name__ == "__main__":
    FW = (3, 4, 5)          # filter_windows
    B, S = 16, 16           # batch, max_length (sequence length)
    V, D = 64, 128          # vocab size, feature_size (embedding dim)
    M = 128                 # feature_maps per filter window
    TASKS = 8               # output tasks / classes

    def bf16_exact(x):
        # Keep parameters exactly representable in bf16 so the MXU result and
        # the XLA reference agree tightly regardless of default matmul precision.
        return x.astype(jnp.bfloat16).astype(jnp.float32)

    key = jax.random.PRNGKey(0)
    ks = jax.random.split(key, 4 + 2 * len(FW))
    ids = jax.random.randint(ks[0], (B, S), 0, V, dtype=jnp.int32)
    table = bf16_exact(jax.random.uniform(ks[1], (V, D), dtype=jnp.float32))
    conv_ws, conv_bs = [], []
    for i, fs in enumerate(FW):
        conv_ws.append(bf16_exact(
            0.05 * jax.random.normal(ks[2 + 2 * i], (fs, D, M), dtype=jnp.float32)))
        conv_bs.append(bf16_exact(
            0.05 * jax.random.normal(ks[3 + 2 * i], (M,), dtype=jnp.float32)))
    lin_w = bf16_exact(
        0.05 * jax.random.normal(ks[2 + 2 * len(FW)], (len(FW) * M, TASKS),
                                 dtype=jnp.float32))
    lin_b = bf16_exact(
        0.05 * jax.random.normal(ks[3 + 2 * len(FW)], (TASKS,), dtype=jnp.float32))

    fwd = jax.jit(functools.partial(textcnn_forward,
                                    filter_windows=FW, batch_block=8))
    out = fwd(ids, table, conv_ws, conv_bs, lin_w, lin_b)
    out = jax.block_until_ready(out)

    ref = textcnn_reference(ids, table, conv_ws, conv_bs, lin_w, lin_b, FW)
    assert out.shape == (B, TASKS)
    assert out.dtype == jnp.float32
    max_err = float(jnp.max(jnp.abs(out - ref)))
    assert max_err < 1e-2, f"max abs error {max_err}"
    print("KERNEL_OK")
</pallas_src>

<mosaic_0001>
module attributes {stable_mosaic.version = 11 : i64} {
  func.func @kernel(%arg0: i32, %arg1: memref<128x1xi32, #tpu.memory_space<vmem>>, %arg2: memref<64x128xf32, #tpu.memory_space<vmem>>, %arg3: memref<128x1536xf32, #tpu.memory_space<vmem>>, %arg4: memref<1x384xf32, #tpu.memory_space<vmem>>, %arg5: memref<384x8xf32, #tpu.memory_space<vmem>>, %arg6: memref<1x8xf32, #tpu.memory_space<vmem>>, %arg7: memref<8x8xf32, #tpu.memory_space<vmem>>) attributes {dimension_semantics = [#tpu.dimension_semantics<parallel>], iteration_bounds = array<i64: 2>, scalar_prefetch = 0 : i64, scratch_operands = 0 : i64, tpu.core_type = #tpu.core_type<tc>, window_params = [{transform_indices = @transform_0, window_bounds = array<i64: 128, 1>}, {pipeline_mode = #tpu.pipeline_mode<synchronous>, transform_indices = @transform_1, window_bounds = array<i64: 64, 128>}, {pipeline_mode = #tpu.pipeline_mode<synchronous>, transform_indices = @transform_2, window_bounds = array<i64: 128, 1536>}, {pipeline_mode = #tpu.pipeline_mode<synchronous>, transform_indices = @transform_3, window_bounds = array<i64: 1, 384>}, {pipeline_mode = #tpu.pipeline_mode<synchronous>, transform_indices = @transform_4, window_bounds = array<i64: 384, 8>}, {pipeline_mode = #tpu.pipeline_mode<synchronous>, transform_indices = @transform_5, window_bounds = array<i64: 1, 8>}, {transform_indices = @transform_6, window_bounds = array<i64: 8, 8>}]} {
    %c0 = arith.constant 0 : index
    %c0_0 = arith.constant 0 : index
    %0 = vector.load %arg1[%c0, %c0_0] : memref<128x1xi32, #tpu.memory_space<vmem>>, vector<128x1xi32>
    %1 = tpu.iota {dimensions = array<i32: 1>} : vector<128x64xi32>
    %2 = vector.broadcast %0 : vector<128x1xi32> to vector<128x64xi32>
    %3 = arith.cmpi eq, %2, %1 : vector<128x64xi32>
    %4 = arith.extui %3 : vector<128x64xi1> to vector<128x64xi32>
    %5 = arith.sitofp %4 : vector<128x64xi32> to vector<128x64xf32>
    %c0_1 = arith.constant 0 : index
    %c0_2 = arith.constant 0 : index
    %6 = vector.load %arg2[%c0_1, %c0_2] : memref<64x128xf32, #tpu.memory_space<vmem>>, vector<64x128xf32>
    %cst = arith.constant dense<0.000000e+00> : vector<128x128xf32>
    %7 = tpu.matmul %5, %6, %cst {dimension_numbers = #tpu.dot_dimension_numbers<[1], [0], [0], [1], [0, 0, 1, 1], [], []>} : vector<128x64xf32>, vector<64x128xf32>, vector<128x128xf32> -> vector<128x128xf32>
    %c0_3 = arith.constant 0 : index
    %c0_4 = arith.constant 0 : index
    %8 = vector.load %arg3[%c0_3, %c0_4] : memref<128x1536xf32, #tpu.memory_space<vmem>>, vector<128x1536xf32>
    %cst_5 = arith.constant dense<0.000000e+00> : vector<128x1536xf32>
    %9 = tpu.matmul %7, %8, %cst_5 {dimension_numbers = #tpu.dot_dimension_numbers<[1], [0], [0], [1], [0, 0, 1, 1], [], []>} : vector<128x128xf32>, vector<128x1536xf32>, vector<128x1536xf32> -> vector<128x1536xf32>
    %10 = vector.shape_cast %9 : vector<128x1536xf32> to vector<8x16x1536xf32>
    %c0_6 = arith.constant 0 : index
    %c0_7 = arith.constant 0 : index
    %11 = vector.load %arg4[%c0_6, %c0_7] : memref<1x384xf32, #tpu.memory_space<vmem>>, vector<1x384xf32>
    %12 = vector.extract_strided_slice %10 {offsets = [0, 0, 0], sizes = [8, 14, 128], strides = [1, 1, 1]} : vector<8x16x1536xf32> to vector<8x14x128xf32>
    %13 = vector.extract_strided_slice %10 {offsets = [0, 1, 128], sizes = [8, 14, 128], strides = [1, 1, 1]} : vector<8x16x1536xf32> to vector<8x14x128xf32>
    %14 = arith.addf %12, %13 : vector<8x14x128xf32>
    %15 = vector.extract_strided_slice %10 {offsets = [0, 2, 256], sizes = [8, 14, 128], strides = [1, 1, 1]} : vector<8x16x1536xf32> to vector<8x14x128xf32>
    %16 = arith.addf %14, %15 : vector<8x14x128xf32>
    %17 = vector.extract_strided_slice %11 {offsets = [0, 0], sizes = [1, 128], strides = [1, 1]} : vector<1x384xf32> to vector<1x128xf32>
    %18 = vector.shape_cast %17 : vector<1x128xf32> to vector<1x1x128xf32>
    %19 = vector.broadcast %18 : vector<1x1x128xf32> to vector<8x14x128xf32>
    %20 = arith.addf %16, %19 : vector<8x14x128xf32>
    %cst_8 = arith.constant 0.000000e+00 : f32
    %21 = vector.broadcast %cst_8 : f32 to vector<8x14x128xf32>
    %22 = arith.maximumf %20, %21 : vector<8x14x128xf32>
    %cst_9 = arith.constant dense<0xFF800000> : vector<8x128xf32>
    %23 = vector.multi_reduction <maximumf>, %22, %cst_9 [1] : vector<8x14x128xf32> to vector<8x128xf32>
    %24 = vector.extract_strided_slice %10 {offsets = [0, 0, 384], sizes = [8, 13, 128], strides = [1, 1, 1]} : vector<8x16x1536xf32> to vector<8x13x128xf32>
    %25 = vector.extract_strided_slice %10 {offsets = [0, 1, 512], sizes = [8, 13, 128], strides = [1, 1, 1]} : vector<8x16x1536xf32> to vector<8x13x128xf32>
    %26 = arith.addf %24, %25 : vector<8x13x128xf32>
    %27 = vector.extract_strided_slice %10 {offsets = [0, 2, 640], sizes = [8, 13, 128], strides = [1, 1, 1]} : vector<8x16x1536xf32> to vector<8x13x128xf32>
    %28 = arith.addf %26, %27 : vector<8x13x128xf32>
    %29 = vector.extract_strided_slice %10 {offsets = [0, 3, 768], sizes = [8, 13, 128], strides = [1, 1, 1]} : vector<8x16x1536xf32> to vector<8x13x128xf32>
    %30 = arith.addf %28, %29 : vector<8x13x128xf32>
    %31 = vector.extract_strided_slice %11 {offsets = [0, 128], sizes = [1, 128], strides = [1, 1]} : vector<1x384xf32> to vector<1x128xf32>
    %32 = vector.shape_cast %31 : vector<1x128xf32> to vector<1x1x128xf32>
    %33 = vector.broadcast %32 : vector<1x1x128xf32> to vector<8x13x128xf32>
    %34 = arith.addf %30, %33 : vector<8x13x128xf32>
    %cst_10 = arith.constant 0.000000e+00 : f32
    %35 = vector.broadcast %cst_10 : f32 to vector<8x13x128xf32>
    %36 = arith.maximumf %34, %35 : vector<8x13x128xf32>
    %cst_11 = arith.constant dense<0xFF800000> : vector<8x128xf32>
    %37 = vector.multi_reduction <maximumf>, %36, %cst_11 [1] : vector<8x13x128xf32> to vector<8x128xf32>
    %38 = vector.extract_strided_slice %10 {offsets = [0, 0, 896], sizes = [8, 12, 128], strides = [1, 1, 1]} : vector<8x16x1536xf32> to vector<8x12x128xf32>
    %39 = vector.extract_strided_slice %10 {offsets = [0, 1, 1024], sizes = [8, 12, 128], strides = [1, 1, 1]} : vector<8x16x1536xf32> to vector<8x12x128xf32>
    %40 = arith.addf %38, %39 : vector<8x12x128xf32>
    %41 = vector.extract_strided_slice %10 {offsets = [0, 2, 1152], sizes = [8, 12, 128], strides = [1, 1, 1]} : vector<8x16x1536xf32> to vector<8x12x128xf32>
    %42 = arith.addf %40, %41 : vector<8x12x128xf32>
    %43 = vector.extract_strided_slice %10 {offsets = [0, 3, 1280], sizes = [8, 12, 128], strides = [1, 1, 1]} : vector<8x16x1536xf32> to vector<8x12x128xf32>
    %44 = arith.addf %42, %43 : vector<8x12x128xf32>
    %45 = vector.extract_strided_slice %10 {offsets = [0, 4, 1408], sizes = [8, 12, 128], strides = [1, 1, 1]} : vector<8x16x1536xf32> to vector<8x12x128xf32>
    %46 = arith.addf %44, %45 : vector<8x12x128xf32>
    %47 = vector.extract_strided_slice %11 {offsets = [0, 256], sizes = [1, 128], strides = [1, 1]} : vector<1x384xf32> to vector<1x128xf32>
    %48 = vector.shape_cast %47 : vector<1x128xf32> to vector<1x1x128xf32>
    %49 = vector.broadcast %48 : vector<1x1x128xf32> to vector<8x12x128xf32>
    %50 = arith.addf %46, %49 : vector<8x12x128xf32>
    %cst_12 = arith.constant 0.000000e+00 : f32
    %51 = vector.broadcast %cst_12 : f32 to vector<8x12x128xf32>
    %52 = arith.maximumf %50, %51 : vector<8x12x128xf32>
    %cst_13 = arith.constant dense<0xFF800000> : vector<8x128xf32>
    %53 = vector.multi_reduction <maximumf>, %52, %cst_13 [1] : vector<8x12x128xf32> to vector<8x128xf32>
    %54 = tpu.concatenate %23, %37, %53 in 1 : vector<8x128xf32>, vector<8x128xf32>, vector<8x128xf32> -> vector<8x384xf32>
    %c0_14 = arith.constant 0 : index
    %c0_15 = arith.constant 0 : index
    %55 = vector.load %arg5[%c0_14, %c0_15] : memref<384x8xf32, #tpu.memory_space<vmem>>, vector<384x8xf32>
    %cst_16 = arith.constant dense<0.000000e+00> : vector<8x8xf32>
    %56 = tpu.matmul %54, %55, %cst_16 {dimension_numbers = #tpu.dot_dimension_numbers<[1], [0], [0], [1], [0, 0, 1, 1], [], []>} : vector<8x384xf32>, vector<384x8xf32>, vector<8x8xf32> -> vector<8x8xf32>
    %c0_17 = arith.constant 0 : index
    %c0_18 = arith.constant 0 : index
    %57 = vector.load %arg6[%c0_17, %c0_18] : memref<1x8xf32, #tpu.memory_space<vmem>>, vector<1x8xf32>
    %58 = vector.broadcast %57 : vector<1x8xf32> to vector<8x8xf32>
    %59 = arith.addf %56, %58 : vector<8x8xf32>
    %c0_19 = arith.constant 0 : index
    %c0_20 = arith.constant 0 : index
    %60 = vector.load %arg7[%c0_19, %c0_20] : memref<8x8xf32, #tpu.memory_space<vmem>>, vector<8x8xf32>
    tpu.vector_store %arg7[%c0_19, %c0_20], %59 {strides = array<i32>} : memref<8x8xf32, #tpu.memory_space<vmem>>, vector<8x8xf32>,
    return
  }
  func.func @transform_0(%arg0: i32) -> (i32, i32) {
    %c0_i32 = arith.constant 0 : i32
    %c0_i32_0 = arith.constant 0 : i32
    return %arg0, %c0_i32 : i32, i32
  }
  func.func @transform_1(%arg0: i32) -> (i32, i32) {
    %c0_i32 = arith.constant 0 : i32
    %c0_i32_0 = arith.constant 0 : i32
    %c0_i32_1 = arith.constant 0 : i32
    return %c0_i32, %c0_i32_0 : i32, i32
  }
  func.func @transform_2(%arg0: i32) -> (i32, i32) {
    %c0_i32 = arith.constant 0 : i32
    %c0_i32_0 = arith.constant 0 : i32
    %c0_i32_1 = arith.constant 0 : i32
    return %c0_i32, %c0_i32_0 : i32, i32
  }
  func.func @transform_3(%arg0: i32) -> (i32, i32) {
    %c0_i32 = arith.constant 0 : i32
    %c0_i32_0 = arith.constant 0 : i32
    %c0_i32_1 = arith.constant 0 : i32
    return %c0_i32, %c0_i32_0 : i32, i32
  }
  func.func @transform_4(%arg0: i32) -> (i32, i32) {
    %c0_i32 = arith.constant 0 : i32
    %c0_i32_0 = arith.constant 0 : i32
    %c0_i32_1 = arith.constant 0 : i32
    return %c0_i32, %c0_i32_0 : i32, i32
  }
  func.func @transform_5(%arg0: i32) -> (i32, i32) {
    %c0_i32 = arith.constant 0 : i32
    %c0_i32_0 = arith.constant 0 : i32
    %c0_i32_1 = arith.constant 0 : i32
    return %c0_i32, %c0_i32_0 : i32, i32
  }
  func.func @transform_6(%arg0: i32) -> (i32, i32) {
    %c0_i32 = arith.constant 0 : i32
    %c0_i32_0 = arith.constant 0 : i32
    return %arg0, %c0_i32 : i32, i32
  }
}

</mosaic_0001>

<bundles_post_ra>
// kernel: textcnn_forward.1
= control target key start
LH: loop header
LB: loop body
LE: loop exit
PB: predicated region body
PF: predicated region fallthrough
CT: control target
= control target key end

     0   :  { %s3510_s21 = smov 0   ;;  %s4887_s0 = inlined_call_operand.vmem [shape: s32[256,1], index: 0, kind: input, shape index: {}]   ;;  %s4888_s1 = inlined_call_operand.vmem [shape: f32[64,128], index: 1, kind: input, shape index: {}]   ;;  %s4889_s2 = inlined_call_operand.vmem [shape: f32[128,1536], index: 2, kind: input, shape index: {}]   ;;  %s4890_s3 = inlined_call_operand.vmem [shape: f32[1,384], index: 3, kind: input, shape index: {}]   ;;  %s4891_s4 = inlined_call_operand.vmem [shape: f32[384,8], index: 4, kind: input, shape index: {}]   ;;  %s4892_s5 = inlined_call_operand.vmem [shape: f32[1,8], index: 5, kind: input, shape index: {}]   ;;  %s4893_s6 = inlined_call_operand.vmem [shape: f32[16,8], index: 6, kind: output, shape index: {}]  }
   0x1 LB: > { %s3516_s22 = sadd.s32 4294967295, %s3469_s21   ;;  %p2994_p0 = scmp.ge.s32.totalorder %s3469_s21, 1  ;;  %s3469_s21 = sphi %s3510_s21, %s16_s21  }
   0x2   : > { %p213_p1 = scmp.lt.s32.totalorder %s3469_s21, 3 }
   0x4   : > { %p214_p2 = pnand %p2994_p0, %p213_p1 }
   0x5   : > { %s2995_s23 = sshll.u32 (!%p214_p2), %s3516_s22, 4  ;;  %v366_v0 = vld [vmem:[%s4888_s1] sm:$0xff] (!%p214_p2)  ;;  %v367_v1 = vld [vmem:[%s4888_s1 + $0x8] sm:$0xff] (!%p214_p2)  ;;  %v368_v2 = vld [vmem:[%s4888_s1 + $0x10] sm:$0xff] (!%p214_p2)  ;;  %v3471_v3 = vmov (!%p214_p2), 0   ;;  %v3472_v7 = vmov (!%p214_p2), 0.0  }
   0x6   : > { %217 = sbr.rel (%p214_p2) target bundleno = 1011 (0x3f3), region = 44  ;;  %3461 = vset.pattern.permute.xlu1 (!%p214_p2), %v3471_v3  ;;  %3460 = vset.pattern.permute.xlu0 (!%p214_p2), %v3471_v3  ;;  %p243_p3 = scmp.lt.s32.totalorder (!%p214_p2), %s2995_s23, 31  ;;  %v3184_v4 = vpack.c.bf16 (!%p214_p2), %v367_v1, %v366_v0  ;;  %v369_v5 = vld [vmem:[%s4888_s1 + $0x18] sm:$0xff] (!%p214_p2)  ;;  %v370_v8 = vld [vmem:[%s4888_s1 + $0x20] sm:$0xff] (!%p214_p2)  ;;  %v371_v9 = vld [vmem:[%s4888_s1 + $0x28] sm:$0xff] (!%p214_p2)  ;;  %vm374_vm0 = vcmask (!%p214_p2), 523264  }
   0x7   : > { %v3188_v6 = vpack.c.bf16 (!%p214_p2), %v369_v5, %v368_v2  ;;  %824 = vmatprep.mubr.f32.mxu1 (!%p214_p2), %v3472_v7  ;;  %v3192_v10 = vpack.c.bf16 (!%p214_p2), %v371_v9, %v370_v8  ;;  %v372_v15 = vld [vmem:[%s4888_s1 + $0x30] sm:$0xff] (!%p214_p2)  ;;  %v373_v16 = vld [vmem:[%s4888_s1 + $0x38] sm:$0xff] (!%p214_p2)  ;;  %v569_v30 = vld [vmem:[%s4889_s2 + $0x8] sm:$0xff] (!%p214_p2)  ;;  %p248_p4 = scmp.lt.s32.totalorder (!%p214_p2), %s3516_s22, 1 }
   0x8   : > { %3185 = vmatprep.subr.bf16.mxu0 (!%p214_p2), %v3184_v4  ;;  %v3196_v19 = vpack.c.bf16 (!%p214_p2), %v373_v16, %v372_v15  ;;  %v581_v31 = vld [vmem:[%s4889_s2 + $0x68] sm:$0xff] (!%p214_p2)  ;;  %v568_v32 = vld [vmem:[%s4889_s2] sm:$0xff] (!%p214_p2)  ;;  %v571_v35 = vld [vmem:[%s4889_s2 + $0x18] sm:$0xff] (!%p214_p2) }
   0x9   : > { %3187 = vmatpush3.bf16.msra.mxu0 (!%p214_p2), %v3184_v4  ;;  %v3200_v33 = vpack.c.bf16 (!%p214_p2), %v581_v31, %v569_v30  ;;  %v580_v34 = vld [vmem:[%s4889_s2 + $0x60] sm:$0xff] (!%p214_p2)  ;;  %v583_v36 = vld [vmem:[%s4889_s2 + $0x78] sm:$0xff] (!%p214_p2)  ;;  %v593_v39 = vld [vmem:[%s4889_s2 + $0xc8] sm:$0xff] (!%p214_p2) }
   0xa   : > { %3189 = vmatprep.subr.bf16.mxu0 (!%p214_p2), %v3188_v6  ;;  %v3202_v37 = vpack.c.bf16 (!%p214_p2), %v580_v34, %v568_v32  ;;  %v3232_v38 = vpack.c.bf16 (!%p214_p2), %v583_v36, %v571_v35  ;;  %v605_v40 = vld [vmem:[%s4889_s2 + $0x128] sm:$0xff] (!%p214_p2)  ;;  %v592_v41 = vld [vmem:[%s4889_s2 + $0xc0] sm:$0xff] (!%p214_p2)  ;;  %v594_v32 = vld [vmem:[%s4889_s2 + $0xd0] sm:$0xff] (!%p214_p2) }
   0xb   : > { %3201 = vmatprep.subr.bf16.mxu1 (!%p214_p2), %v3200_v33  ;;  %v604_v42 = vld [vmem:[%s4889_s2 + $0x120] sm:$0xff] (!%p214_p2)  ;;  %v3204_v43 = vpack.c.bf16 (!%p214_p2), %v605_v40, %v593_v39  ;;  %v617_v45 = vld [vmem:[%s4889_s2 + $0x188] sm:$0xff] (!%p214_p2)  ;;  %v606_v33 = vld [vmem:[%s4889_s2 + $0x130] sm:$0xff] (!%p214_p2) }
   0xc   : > { %3203 = vmatpush1.bf16.msra.mxu1 (!%p214_p2), %v3202_v37  ;;  %v3206_v44 = vpack.c.bf16 (!%p214_p2), %v604_v42, %v592_v41  ;;  %v629_v46 = vld [vmem:[%s4889_s2 + $0x1e8] sm:$0xff] (!%p214_p2)  ;;  %v616_v48 = vld [vmem:[%s4889_s2 + $0x180] sm:$0xff] (!%p214_p2)  ;;  %v619_v35 = vld [vmem:[%s4889_s2 + $0x198] sm:$0xff] (!%p214_p2)  ;;  %v3238_v40 = vpack.c.bf16 (!%p214_p2), %v606_v33, %v594_v32 }
   0xd   : > { %s4895_s23 = smov (!%p243_p3, %s2995_s23), 31  ;;  %3191 = vmatpush3.bf16.msra.mxu0 %v3188_v6  ;;  %3205 = vmatprep.subr.bf16.mxu1 %v3204_v43  ;;  %v3208_v47 = vpack.c.bf16 %v629_v46, %v617_v45  ;;  %v628_v49 = vld [vmem:[%s4889_s2 + $0x1e0] sm:$0xff]  ;;  %v641_v51 = vld [vmem:[%s4889_s2 + $0x248] sm:$0xff]  ;;  %v631_v36 = vld [vmem:[%s4889_s2 + $0x1f8] sm:$0xff]  ;;  %s4897_s22 = smov (!%p248_p4, %s3516_s22), 1 }
   0xe   : > { %s2996_s12 = sshll.u32 %s4895_s23, 3  ;;  %3193 = vmatprep.subr.bf16.mxu0 %v3192_v10  ;;  %v3210_v50 = vpack.c.bf16 %v628_v49, %v616_v48  ;;  %v653_v52 = vld [vmem:[%s4889_s2 + $0x2a8] sm:$0xff]  ;;  %v640_v54 = vld [vmem:[%s4889_s2 + $0x240] sm:$0xff]  ;;  %v3240_v41 = vpack.c.bf16 %v631_v36, %v619_v35  ;;  %v618_v42 = vld [vmem:[%s4889_s2 + $0x190] sm:$0xff]  ;;  %s2997_s24 = sshll.u32 %s4897_s22, 3 }
   0xf   : > { %s3543_s15 = scalar_lea.vmem %s4887_s0, %s2996_s12  ;;  %v3212_v53 = vpack.c.bf16 %v653_v52, %v641_v51  ;;  %v652_v55 = vld [vmem:[%s4889_s2 + $0x2a0] sm:$0xff]  ;;  %v665_v56 = vld [vmem:[%s4889_s2 + $0x308] sm:$0xff]  ;;  %v630_v43 = vld [vmem:[%s4889_s2 + $0x1f0] sm:$0xff]  ;;  %s251_s27 = scalar_lea.vmem %s4893_s6, %s2997_s24 }
  0x10   : > { %v254_v11 = vld [vmem:[%s3543_s15 + $0x10] sm:$0xff]  ;;  %v252_v12 = vld [vmem:[%s3543_s15] sm:$0xff]  ;;  %v255_v13 = vld [vmem:[%s3543_s15 + $0x18] sm:$0xff]  ;;  %3207 = vmatpush1.bf16.msra.mxu1 %v3206_v44  ;;  %v3214_v58 = vpack.c.bf16 %v652_v55, %v640_v54  ;;  %v3242_v49 = vpack.c.bf16 %v630_v43, %v618_v42 }
  0x11   : > { %277 = vperm.xlu1 %3461, %v254_v11   ;;  %271 = vperm.xlu0 %3460, %v252_v12   ;;  %v253_v14 = vld [vmem:[%s3543_s15 + $0x8] sm:$0xff]  ;;  %v256_v18 = vld [vmem:[%s3543_s15 + $0x20] sm:$0xff]  ;;  %v259_v20 = vld [vmem:[%s3543_s15 + $0x38] sm:$0xff] }
  0x12   : > { %v257_v17 = vld [vmem:[%s3543_s15 + $0x28] sm:$0xff]  ;;  %3195 = vmatpush3.bf16.msra.mxu0 %v3192_v10  ;;  %v258_v21 = vld [vmem:[%s3543_s15 + $0x30] sm:$0xff]  ;;  %v260_v23 = vld [vmem:[%s3543_s15 + $0x40] sm:$0xff]  ;;  %3209 = vmatprep.subr.bf16.mxu1 %v3208_v47 }
  0x13   : > { %3197 = vmatprep.subr.bf16.mxu0 %v3196_v19  ;;  %v261_v22 = vld [vmem:[%s3543_s15 + $0x48] sm:$0xff]  ;;  %v263_v24 = vld [vmem:[%s3543_s15 + $0x58] sm:$0xff]  ;;  %v262_v25 = vld [vmem:[%s3543_s15 + $0x50] sm:$0xff] }
  0x14   : > { %v265_v26 = vld [vmem:[%s3543_s15 + $0x68] sm:$0xff]  ;;  %v264_v27 = vld [vmem:[%s3543_s15 + $0x60] sm:$0xff]  ;;  %v267_v28 = vld [vmem:[%s3543_s15 + $0x78] sm:$0xff]  ;;  %3211 = vmatpush1.bf16.msra.mxu1 %v3210_v50 }
  0x15   : > { %280 = vperm.xlu1 %3461, %v255_v13   ;;  %274 = vperm.xlu0 %3460, %v253_v14   ;;  %v266_v29 = vld [vmem:[%s3543_s15 + $0x70] sm:$0xff]  ;;  %v677_v57 = vld [vmem:[%s4889_s2 + $0x368] sm:$0xff]  ;;  %v664_v60 = vld [vmem:[%s4889_s2 + $0x300] sm:$0xff] }
  0x16   : > { %3199 = vmatpush3.bf16.msra.mxu0 %v3196_v19  ;;  %3213 = vmatprep.subr.bf16.mxu1 %v3212_v53  ;;  %v3216_v59 = vpack.c.bf16 %v677_v57, %v665_v56  ;;  %v676_v61 = vld [vmem:[%s4889_s2 + $0x360] sm:$0xff]  ;;  %v689_v62 = vld [vmem:[%s4889_s2 + $0x3c8] sm:$0xff]  ;;  %v643_v45 = vld [vmem:[%s4889_s2 + $0x258] sm:$0xff] }
  0x17   : > { %3233 = vmatprep.subr.bf16.mxu0 %v3232_v38  ;;  %v701_v63 = vld [vmem:[%s4889_s2 + $0x428] sm:$0xff]  ;;  %v3218_v0 = vpack.c.bf16 %v676_v61, %v664_v60  ;;  %v688_v2 = vld [vmem:[%s4889_s2 + $0x3c0] sm:$0xff]  ;;  %v655_v46 = vld [vmem:[%s4889_s2 + $0x2b8] sm:$0xff] }
  0x18   : > { %3215 = vmatpush1.bf16.msra.mxu1 %v3214_v58  ;;  %v3220_v1 = vpack.c.bf16 %v701_v63, %v689_v62  ;;  %v700_v3 = vld [vmem:[%s4889_s2 + $0x420] sm:$0xff]  ;;  %v713_v4 = vld [vmem:[%s4889_s2 + $0x488] sm:$0xff]  ;;  %v3244_v50 = vpack.c.bf16 %v655_v46, %v643_v45  ;;  %v642_v51 = vld [vmem:[%s4889_s2 + $0x250] sm:$0xff] }
  0x19   : > { %286 = vperm.xlu1 %3461, %v257_v17   ;;  %283 = vperm.xlu0 %3460, %v256_v18   ;;  %v725_v5 = vld [vmem:[%s4889_s2 + $0x4e8] sm:$0xff]  ;;  %v3222_v6 = vpack.c.bf16 %v700_v3, %v688_v2  ;;  %v712_v9 = vld [vmem:[%s4889_s2 + $0x480] sm:$0xff]  ;;  %v268_v18 = vlaneseq  ;;  %v654_v52 = vld [vmem:[%s4889_s2 + $0x2b0] sm:$0xff] }
  0x1a   : > { %3217 = vmatprep.subr.bf16.mxu1 %v3216_v59  ;;  %v3224_v8 = vpack.c.bf16 %v725_v5, %v713_v4  ;;  %v724_v10 = vld [vmem:[%s4889_s2 + $0x4e0] sm:$0xff]  ;;  %v737_v11 = vld [vmem:[%s4889_s2 + $0x548] sm:$0xff]  ;;  %v667_v55 = vld [vmem:[%s4889_s2 + $0x318] sm:$0xff]  ;;  %v3246_v59 = vpack.c.bf16 %v654_v52, %v642_v51 }
  0x1b   : > { %v749_v12 = vld [vmem:[%s4889_s2 + $0x5a8] sm:$0xff]  ;;  %v3226_v13 = vpack.c.bf16 %v724_v10, %v712_v9  ;;  %v736_v15 = vld [vmem:[%s4889_s2 + $0x540] sm:$0xff]  ;;  %v3670_v19 = vand.u32 127, %v268_v18  ;;  %v679_v56 = vld [vmem:[%s4889_s2 + $0x378] sm:$0xff] }
  0x1c   : > { %3219 = vmatpush1.bf16.msra.mxu1 %v3218_v0  ;;  %v3228_v14 = vpack.c.bf16 %v749_v12, %v737_v11  ;;  %v748_v16 = vld [vmem:[%s4889_s2 + $0x5a0] sm:$0xff]  ;;  %v3248_v60 = vpack.c.bf16 %v679_v56, %v667_v55  ;;  %v666_v61 = vld [vmem:[%s4889_s2 + $0x310] sm:$0xff]  ;;  %v703_v2 = vld [vmem:[%s4889_s2 + $0x438] sm:$0xff] }
  0x1d   : > { %292 = vperm.xlu1 %3461, %v259_v20   ;;  %289 = vperm.xlu0 %3460, %v258_v21   ;;  %v3230_v17 = vpack.c.bf16 %v748_v16, %v736_v15  ;;  %v678_v62 = vld [vmem:[%s4889_s2 + $0x370] sm:$0xff]  ;;  %v715_v12 = vld [vmem:[%s4889_s2 + $0x498] sm:$0xff]  ;;  %v573_v36 = vld [vmem:[%s4889_s2 + $0x28] sm:$0xff] }
  0x1e   : > { %3221 = vmatprep.subr.bf16.mxu1 %v3220_v1  ;;  %v691_v1 = vld [vmem:[%s4889_s2 + $0x3d8] sm:$0xff]  ;;  %v3250_v5 = vpack.c.bf16 %v678_v62, %v666_v61  ;;  %v702_v9 = vld [vmem:[%s4889_s2 + $0x430] sm:$0xff]  ;;  %v584_v42 = vld [vmem:[%s4889_s2 + $0x80] sm:$0xff] }
  0x1f   : > { %v574_v43 = vld [vmem:[%s4889_s2 + $0x30] sm:$0xff]  ;;  %v597_v45 = vld [vmem:[%s4889_s2 + $0xe8] sm:$0xff]  ;;  %v596_v52 = vld [vmem:[%s4889_s2 + $0xe0] sm:$0xff] }
  0x20   : > { %3223 = vmatpush1.bf16.msra.mxu1 %v3222_v6  ;;  %v3252_v6 = vpack.c.bf16 %v703_v2, %v691_v1  ;;  %v609_v46 = vld [vmem:[%s4889_s2 + $0x148] sm:$0xff]  ;;  %v623_v61 = vld [vmem:[%s4889_s2 + $0x1b8] sm:$0xff]  ;;  %v620_v2 = vld [vmem:[%s4889_s2 + $0x1a0] sm:$0xff] }
  0x21   : > { %298 = vperm.xlu1 %3461, %v261_v22   ;;  %295 = vperm.xlu0 %3460, %v260_v23   ;;  %v570_v22 = vld [vmem:[%s4889_s2 + $0x10] sm:$0xff]  ;;  %v3268_v55 = vpack.c.bf16 %v609_v46, %v597_v45  ;;  %v635_v62 = vld [vmem:[%s4889_s2 + $0x218] sm:$0xff]  ;;  %v692_v46 = vld [vmem:[%s4889_s2 + $0x3e0] sm:$0xff] }
  0x22   : > { %3225 = vmatprep.subr.bf16.mxu1 %v3224_v8  ;;  %v582_v23 = vld [vmem:[%s4889_s2 + $0x70] sm:$0xff] }
  0x23   : > { %v690_v8 = vld [vmem:[%s4889_s2 + $0x3d0] sm:$0xff] }
  0x24   : > { %3227 = vmatpush1.bf16.msra.mxu1 %v3226_v13  ;;  %v727_v13 = vld [vmem:[%s4889_s2 + $0x4f8] sm:$0xff]  ;;  %v3254_v16 = vpack.c.bf16 %v702_v9, %v690_v8  ;;  %v622_v8 = vld [vmem:[%s4889_s2 + $0x1b0] sm:$0xff] }
  0x25   : > { %304 = vperm.xlu1 %3461, %v263_v24   ;;  %301 = vperm.xlu0 %3460, %v262_v25   ;;  %v595_v25 = vld [vmem:[%s4889_s2 + $0xd8] sm:$0xff]  ;;  %v634_v9 = vld [vmem:[%s4889_s2 + $0x210] sm:$0xff] }
  0x26   : > { %3229 = vmatprep.subr.bf16.mxu1 %v3228_v14 }
  0x28   : > { %3231 = vmatpush1.bf16.msra.mxu1 %v3230_v17  ;;  %v3256_v17 = vpack.c.bf16 %v727_v13, %v715_v12  ;;  %v647_v12 = vld [vmem:[%s4889_s2 + $0x278] sm:$0xff] }
  0x29   : > { %310 = vperm.xlu1 %3461, %v265_v26   ;;  %307 = vperm.xlu0 %3460, %v264_v27   ;;  %v607_v26 = vld [vmem:[%s4889_s2 + $0x138] sm:$0xff] }
  0x2a   : > { %v3236_v31 = vpack.c.bf16 %v607_v26, %v595_v25  ;;  %v751_v25 = vld [vmem:[%s4889_s2 + $0x5b8] sm:$0xff] }
  0x2b   : > { %v659_v13 = vld [vmem:[%s4889_s2 + $0x2d8] sm:$0xff] }
  0x2d   : > { %316 = vperm.xlu1 %3461, %v267_v28   ;;  %313 = vperm.xlu0 %3460, %v266_v29   ;;  %v3234_v29 = vpack.c.bf16 %v582_v23, %v570_v22 }
  0x90   : > { %v278_v20 = vpop.permute.xlu1 %277  ;;  %v272_v21 = vpop.permute.xlu0 %271 }
  0x91   : > { %vm318_vm1 = vcmp.eq.s32.totalorder %v272_v21, %v3670_v19  ;;  %vm320_vm2 = vcmp.eq.s32.totalorder %v278_v20, %v3670_v19  ;;  %v714_v20 = vld [vmem:[%s4889_s2 + $0x490] sm:$0xff] }
  0x92   : > { %v2998_v24 = vsel %vm318_vm1, 1.0, %v3472_v7  ;;  %v3000_v30 = vsel %vm320_vm2, 1.0, %v3472_v7  ;;  %v726_v21 = vld [vmem:[%s4889_s2 + $0x4f0] sm:$0xff]  ;;  %vm1743_vm2 = vcmask 1046528  }
  0x93   : > { %3125 = vmatprep.mubr.msk.f32.mxu0 %vm374_vm0, %v2998_v24  ;;  %v739_v24 = vld [vmem:[%s4889_s2 + $0x558] sm:$0xff] }
  0x94   : > { %v281_v27 = vpop.permute.xlu1 %280  ;;  %v275_v28 = vpop.permute.xlu0 %274 }
  0x95   : > { %vm321_vm3 = vcmp.eq.s32.totalorder %v281_v27, %v3670_v19  ;;  %vm319_vm4 = vcmp.eq.s32.totalorder %v275_v28, %v3670_v19  ;;  %v3258_v28 = vpack.c.bf16 %v726_v21, %v714_v20  ;;  %v656_v20 = vld [vmem:[%s4889_s2 + $0x2c0] sm:$0xff] }
  0x96   : > { %v2999_v34 = vsel %vm319_vm4, 1.0, %v3472_v7  ;;  %v3001_v37 = vsel %vm321_vm3, 1.0, %v3472_v7  ;;  %vm2693_vm3 = vcmask 1041409   ;;  %vm2695_vm4 = vcmask 1042434  }
  0x97   : > { %3126 = vmatmul.mubr.msk.f32.vlgmr.msra.gmra.mrb[0].mxu0 %vm374_vm0, %v2999_v34 }
  0x98   : > { %v287_v38 = vpop.permute.xlu1 %286  ;;  %v284_v39 = vpop.permute.xlu0 %283  ;;  %3128 = vmatprep.mubr.msk.f32.mxu0 %vm374_vm0, %v3000_v30  ;;  %3235 = vmatpush1.bf16.msra.mxu0 %v3234_v29  ;;  %v3260_v29 = vpack.c.bf16 %v751_v25, %v739_v24  ;;  %v738_v30 = vld [vmem:[%s4889_s2 + $0x550] sm:$0xff] }
  0x99   : > { %vm322_vm5 = vcmp.eq.s32.totalorder %v284_v39, %v3670_v19  ;;  %3237 = vmatprep.subr.bf16.mxu0 %v3236_v31  ;;  %vm323_vm6 = vcmp.eq.s32.totalorder %v287_v38, %v3670_v19  ;;  %v750_v31 = vld [vmem:[%s4889_s2 + $0x5b0] sm:$0xff]  ;;  %v575_v38 = vld [vmem:[%s4889_s2 + $0x38] sm:$0xff] }
  0x9a   : > { %v3002_v44 = vsel %vm322_vm5, 1.0, %v3472_v7  ;;  %v3003_v53 = vsel %vm323_vm6, 1.0, %v3472_v7  ;;  %v3262_v34 = vpack.c.bf16 %v750_v31, %v738_v30  ;;  %v587_v39 = vld [vmem:[%s4889_s2 + $0x98] sm:$0xff]  ;;  %v646_v24 = vld [vmem:[%s4889_s2 + $0x270] sm:$0xff]  ;;  %vm2697_vm5 = vcmask 1043459  }
  0x9b   : > { %3129 = vmatmul.mubr.msk.f32.gmra.mrb[2].mxu0 %vm374_vm0, %v3001_v37  ;;  %v658_v25 = vld [vmem:[%s4889_s2 + $0x2d0] sm:$0xff]  ;;  %vm2699_vm6 = vcmask 1044484  }
  0x9c   : > { %v293_v47 = vpop.permute.xlu1 %292  ;;  %3131 = vmatprep.mubr.msk.f32.mxu0 %vm374_vm0, %v3002_v44  ;;  %v290_v48 = vpop.permute.xlu0 %289  ;;  %3239 = vmatpush1.bf16.msra.mxu0 %v3238_v40  ;;  %v3296_v40 = vpack.c.bf16 %v587_v39, %v575_v38  ;;  %v586_v44 = vld [vmem:[%s4889_s2 + $0x90] sm:$0xff]  ;;  %v693_v39 = vld [vmem:[%s4889_s2 + $0x3e8] sm:$0xff] }
  0x9d   : > { %vm324_vm7 = vcmp.eq.s32.totalorder %v290_v48, %v3670_v19  ;;  %3241 = vmatprep.subr.bf16.mxu0 %v3240_v41  ;;  %vm325_vm8 = vcmp.eq.s32.totalorder %v293_v47, %v3670_v19  ;;  %v572_v41 = vld [vmem:[%s4889_s2 + $0x20] sm:$0xff]  ;;  %v599_v47 = vld [vmem:[%s4889_s2 + $0xf8] sm:$0xff]  ;;  %v3298_v51 = vpack.c.bf16 %v586_v44, %v574_v43  ;;  %v682_v38 = vld [vmem:[%s4889_s2 + $0x390] sm:$0xff] }
  0x9e   : > { %v3004_v54 = vsel %vm324_vm7, 1.0, %v3472_v7  ;;  %v3005_v63 = vsel %vm325_vm8, 1.0, %v3472_v7  ;;  %v611_v48 = vld [vmem:[%s4889_s2 + $0x158] sm:$0xff]  ;;  %vm2135_vm7 = vcmask 1044480   ;;  %vm2701_vm8 = vcmask 1045509  }
  0x9f   : > { %3132 = vmatmul.mubr.msk.f32.gmra.mrb[4].mxu0 %vm374_vm0, %v3003_v53  ;;  %v608_v53 = vld [vmem:[%s4889_s2 + $0x140] sm:$0xff]  ;;  %v3300_v56 = vpack.c.bf16 %v611_v48, %v599_v47 }
  0xa0   : > { %v299_v57 = vpop.permute.xlu1 %298  ;;  %3134 = vmatprep.mubr.msk.f32.mxu0 %vm374_vm0, %v3004_v54  ;;  %v296_v58 = vpop.permute.xlu0 %295  ;;  %3243 = vmatpush1.bf16.msra.mxu0 %v3242_v49  ;;  %v3266_v49 = vpack.c.bf16 %v584_v42, %v572_v41  ;;  %v695_v41 = vld [vmem:[%s4889_s2 + $0x3f8] sm:$0xff]  ;;  %v704_v47 = vld [vmem:[%s4889_s2 + $0x440] sm:$0xff] }
  0xa1   : > { %vm326_vm9 = vcmp.eq.s32.totalorder %v296_v58, %v3670_v19  ;;  %3245 = vmatprep.subr.bf16.mxu0 %v3244_v50  ;;  %vm327_vm10 = vcmp.eq.s32.totalorder %v299_v57, %v3670_v19  ;;  %v598_v57 = vld [vmem:[%s4889_s2 + $0xf0] sm:$0xff]  ;;  %v707_v42 = vld [vmem:[%s4889_s2 + $0x458] sm:$0xff] }
  0xa2   : > { %v3006_v0 = vsel %vm326_vm9, 1.0, %v3472_v7  ;;  %v3007_v10 = vsel %vm327_vm10, 1.0, %v3472_v7  ;;  %v610_v58 = vld [vmem:[%s4889_s2 + $0x150] sm:$0xff]  ;;  %vm2703_vm9 = vcmask 1046534   ;;  %vm2705_vm10 = vcmask 1047559  }
  0xa3   : > { %3135 = vmatmul.mubr.msk.f32.gmra.mrb[6].mxu0 %vm374_vm0, %v3005_v63  ;;  %v3302_v1 = vpack.c.bf16 %v610_v58, %v598_v57  ;;  %v719_v57 = vld [vmem:[%s4889_s2 + $0x4b8] sm:$0xff] }
  0xa4   : > { %v305_v3 = vpop.permute.xlu1 %304  ;;  %3137 = vmatprep.mubr.msk.f32.mxu0 %vm374_vm0, %v3006_v0  ;;  %v302_v4 = vpop.permute.xlu0 %301  ;;  %3247 = vmatpush1.bf16.msra.mxu0 %v3246_v59  ;;  %v621_v59 = vld [vmem:[%s4889_s2 + $0x1a8] sm:$0xff]  ;;  %v3270_v0 = vpack.c.bf16 %v608_v53, %v596_v52  ;;  %v694_v52 = vld [vmem:[%s4889_s2 + $0x3f0] sm:$0xff]  ;;  %v731_v58 = vld [vmem:[%s4889_s2 + $0x518] sm:$0xff] }
  0xa5   : > { %vm328_vm11 = vcmp.eq.s32.totalorder %v302_v4, %v3670_v19  ;;  %3249 = vmatprep.subr.bf16.mxu0 %v3248_v60  ;;  %vm329_vm12 = vcmp.eq.s32.totalorder %v305_v3, %v3670_v19  ;;  %v633_v60 = vld [vmem:[%s4889_s2 + $0x208] sm:$0xff]  ;;  %v632_v3 = vld [vmem:[%s4889_s2 + $0x200] sm:$0xff]  ;;  %v706_v53 = vld [vmem:[%s4889_s2 + $0x450] sm:$0xff] }
  0xa6   : > { %v3008_v11 = vsel %vm328_vm11, 1.0, %v3472_v7  ;;  %v3009_v22 = vsel %vm329_vm12, 1.0, %v3472_v7  ;;  %vm3474_vm11 = vmmov 0   ;;  %vm2526_vm12 = vcmask 1043456  }
  0xa7   : > { %3138 = vmatmul.mubr.msk.f32.gmra.mrb[8].mxu0 %vm374_vm0, %v3007_v10  ;;  %v645_v10 = vld [vmem:[%s4889_s2 + $0x268] sm:$0xff] }
  0xa8   : > { %v311_v14 = vpop.permute.xlu1 %310  ;;  %3140 = vmatprep.mubr.msk.f32.mxu0 %vm374_vm0, %v3008_v11  ;;  %v308_v15 = vpop.permute.xlu0 %307  ;;  %3251 = vmatpush1.bf16.msra.mxu0 %v3250_v5  ;;  %v3272_v5 = vpack.c.bf16 %v633_v60, %v621_v59  ;;  %v657_v11 = vld [vmem:[%s4889_s2 + $0x2c8] sm:$0xff]  ;;  %v3286_v60 = vpack.c.bf16 %v704_v47, %v692_v46 }
  0xa9   : > { %vm330_vm13 = vcmp.eq.s32.totalorder %v308_v15, %v3670_v19  ;;  %3253 = vmatprep.subr.bf16.mxu0 %v3252_v6  ;;  %vm331_vm14 = vcmp.eq.s32.totalorder %v311_v14, %v3670_v19  ;;  %v3304_v6 = vpack.c.bf16 %v635_v62, %v623_v61  ;;  %v3274_v15 = vpack.c.bf16 %v632_v3, %v620_v2  ;;  %v716_v62 = vld [vmem:[%s4889_s2 + $0x4a0] sm:$0xff] }
  0xaa   : > { %v3010_v23 = vsel %vm330_vm13, 1.0, %v3472_v7  ;;  %v3011_v32 = vsel %vm331_vm14, 1.0, %v3472_v7  ;;  %v3318_v61 = vpack.c.bf16 %v706_v53, %v694_v52  ;;  %v3320_v3 = vpack.c.bf16 %v731_v58, %v719_v57  ;;  %v625_v57 = vld [vmem:[%s4889_s2 + $0x1c8] sm:$0xff] }
  0xab   : > { %3141 = vmatmul.mubr.msk.f32.gmra.mrb[10].mxu0 %vm374_vm0, %v3009_v22  ;;  %v3276_v22 = vpack.c.bf16 %v657_v11, %v645_v10  ;;  %v743_v10 = vld [vmem:[%s4889_s2 + $0x578] sm:$0xff]  ;;  %v637_v58 = vld [vmem:[%s4889_s2 + $0x228] sm:$0xff]  ;;  %vm2935_vm13 = vcmask 64512  }
  0xac   : > { %v317_v26 = vpop.permute.xlu1 %316  ;;  %3143 = vmatprep.mubr.msk.f32.mxu0 %vm374_vm0, %v3010_v23  ;;  %v314_v27 = vpop.permute.xlu0 %313  ;;  %3255 = vmatpush1.bf16.msra.mxu0 %v3254_v16  ;;  %v3306_v16 = vpack.c.bf16 %v634_v9, %v622_v8  ;;  %v3308_v23 = vpack.c.bf16 %v659_v13, %v647_v12  ;;  %v741_v8 = vld [vmem:[%s4889_s2 + $0x568] sm:$0xff]  ;;  %v755_v11 = vld [vmem:[%s4889_s2 + $0x5d8] sm:$0xff] }
  0xad   : > { %vm332_vm15 = vcmp.eq.s32.totalorder %v314_v27, %v3670_v19  ;;  %3257 = vmatprep.subr.bf16.mxu0 %v3256_v17  ;;  %vm333_vm1 = vcmp.eq.s32.totalorder %v317_v26, %v3670_v19  ;;  %v585_v19 = vld [vmem:[%s4889_s2 + $0x88] sm:$0xff]  ;;  %v644_v17 = vld [vmem:[%s4889_s2 + $0x260] sm:$0xff] }
  0xae   : > { %v3012_v33 = vsel %vm332_vm15, 1.0, %v3472_v7  ;;  %v3013_v35 = vsel %vm333_vm1, 1.0, %v3472_v7  ;;  %v3264_v37 = vpack.c.bf16 %v585_v19, %v573_v36  ;;  %v669_v26 = vld [vmem:[%s4889_s2 + $0x328] sm:$0xff]  ;;  %v3278_v31 = vpack.c.bf16 %v656_v20, %v644_v17  ;;  %v752_v17 = vld [vmem:[%s4889_s2 + $0x5c0] sm:$0xff] }
  0xaf   : > { %3144 = vmatmul.mubr.msk.f32.gmra.mrb[12].mxu0 %vm374_vm0, %v3011_v32  ;;  %v681_v27 = vld [vmem:[%s4889_s2 + $0x388] sm:$0xff]  ;;  %v3310_v32 = vpack.c.bf16 %v658_v25, %v646_v24  ;;  %v742_v24 = vld [vmem:[%s4889_s2 + $0x570] sm:$0xff] }
  0xb0   : > { %3146 = vmatprep.mubr.msk.f32.mxu0 %vm374_vm0, %v3012_v33  ;;  %3259 = vmatpush1.bf16.msra.mxu0 %v3258_v28  ;;  %v671_v28 = vld [vmem:[%s4889_s2 + $0x338] sm:$0xff]  ;;  %v668_v33 = vld [vmem:[%s4889_s2 + $0x320] sm:$0xff]  ;;  %v3280_v36 = vpack.c.bf16 %v681_v27, %v669_v26  ;;  %v753_v9 = vld [vmem:[%s4889_s2 + $0x5c8] sm:$0xff] }
  0xb1   : > { %3261 = vmatprep.subr.bf16.mxu0 %v3260_v29  ;;  %3265 = vmatprep.subr.bf16.mxu1 %v3264_v37  ;;  %v683_v29 = vld [vmem:[%s4889_s2 + $0x398] sm:$0xff]  ;;  %v670_v37 = vld [vmem:[%s4889_s2 + $0x330] sm:$0xff]  ;;  %v577_v26 = vld [vmem:[%s4889_s2 + $0x48] sm:$0xff] }
  0xb2   : > { %v3312_v19 = vpack.c.bf16 %v683_v29, %v671_v28  ;;  %v3314_v45 = vpack.c.bf16 %v682_v38, %v670_v37  ;;  %v754_v25 = vld [vmem:[%s4889_s2 + $0x5d0] sm:$0xff]  ;;  %v589_v27 = vld [vmem:[%s4889_s2 + $0xa8] sm:$0xff]  ;;  %v579_v28 = vld [vmem:[%s4889_s2 + $0x58] sm:$0xff] }
  0xb3   : > { %3147 = vmatmul.mubr.msk.f32.gmra.mrb[14].mxu0 %vm374_vm0, %v3013_v35  ;;  %v591_v29 = vld [vmem:[%s4889_s2 + $0xb8] sm:$0xff]  ;;  %v576_v37 = vld [vmem:[%s4889_s2 + $0x40] sm:$0xff]  ;;  %vm1816_vm0 = vcmask 1045504  }
  0xb4   : > { %3263 = vmatpush1.bf16.msra.mxu0 %v3262_v34  ;;  %985 = vmatprep.mubr.f32.mxu0 %v3472_v7  ;;  %v680_v34 = vld [vmem:[%s4889_s2 + $0x380] sm:$0xff] }
  0xb5   : > { %3297 = vmatprep.subr.bf16.mxu0 %v3296_v40  ;;  %v705_v40 = vld [vmem:[%s4889_s2 + $0x448] sm:$0xff]  ;;  %v3282_v44 = vpack.c.bf16 %v680_v34, %v668_v33  ;;  %v3326_v33 = vpack.c.bf16 %v754_v25, %v742_v24  ;;  %v588_v38 = vld [vmem:[%s4889_s2 + $0xa0] sm:$0xff] }
  0xb6   : > { %v3330_v46 = vpack.c.bf16 %v588_v38, %v576_v37  ;;  %v672_v37 = vld [vmem:[%s4889_s2 + $0x340] sm:$0xff] }
  0xb7   : > { %v684_v38 = vld [vmem:[%s4889_s2 + $0x3a0] sm:$0xff] }
 0x16a   : > { %v3847_v50 = vpop.f32.mrb[0].mxu0 }
 0x16b   : > { %v3855_v54 = vpop.f32.mrb[1].mxu0 }
 0x16c   : > { %825 = vmatmul.mubr.f32.vlgmr.msra.gmra.mrb[0].mxu1 %v3855_v54  ;;  %986 = vmatmul.mubr.f32.vlgmr.msra.gmra.mrb[16].mxu0 %v3855_v54 }
 0x16d   : > { %3267 = vmatpush1.bf16.msra.mxu1 %v3266_v49  ;;  %830 = vmatprep.mubr.f32.mxu1 %v3472_v7  ;;  %v3284_v49 = vpack.c.bf16 %v705_v40, %v693_v39  ;;  %v578_v39 = vld [vmem:[%s4889_s2 + $0x50] sm:$0xff] }
 0x16e   : > { %v3878_v63 = vpop.f32.mrb[2].mxu0  ;;  %991 = vmatprep.mubr.f32.mxu0 %v3472_v7  ;;  %3299 = vmatpush1.bf16.msra.mxu0 %v3298_v51  ;;  %v3316_v51 = vpack.c.bf16 %v707_v42, %v695_v41  ;;  %v590_v40 = vld [vmem:[%s4889_s2 + $0xb0] sm:$0xff]  ;;  %v601_v41 = vld [vmem:[%s4889_s2 + $0x108] sm:$0xff] }
 0x16f   : > { %v3887_v4 = vpop.f32.mrb[3].mxu0  ;;  %3269 = vmatprep.subr.bf16.mxu1 %v3268_v55  ;;  %3301 = vmatprep.subr.bf16.mxu0 %v3300_v56  ;;  %v717_v55 = vld [vmem:[%s4889_s2 + $0x4a8] sm:$0xff]  ;;  %v3362_v47 = vpack.c.bf16 %v590_v40, %v578_v39 }
 0x170   : > { %831 = vmatmul.mubr.f32.gmra.mrb[2].mxu1 %v3847_v50  ;;  %992 = vmatmul.mubr.f32.gmra.mrb[18].mxu0 %v3847_v50  ;;  %v729_v56 = vld [vmem:[%s4889_s2 + $0x508] sm:$0xff] }
 0x171   : > { %836 = vmatprep.mubr.f32.mxu1 %v3472_v7  ;;  %997 = vmatprep.mubr.f32.mxu0 %v3472_v7  ;;  %v3288_v2 = vpack.c.bf16 %v729_v56, %v717_v55  ;;  %v613_v42 = vld [vmem:[%s4889_s2 + $0x168] sm:$0xff]  ;;  %v602_v55 = vld [vmem:[%s4889_s2 + $0x110] sm:$0xff] }
 0x172   : > { %v3911_v14 = vpop.f32.mrb[4].mxu0  ;;  %3271 = vmatpush1.bf16.msra.mxu1 %v3270_v0  ;;  %3303 = vmatpush1.bf16.msra.mxu0 %v3302_v1  ;;  %v728_v0 = vld [vmem:[%s4889_s2 + $0x500] sm:$0xff]  ;;  %v3332_v52 = vpack.c.bf16 %v613_v42, %v601_v41  ;;  %v614_v56 = vld [vmem:[%s4889_s2 + $0x170] sm:$0xff] }
 0x173   : > { %v3919_v21 = vpop.f32.mrb[5].mxu0  ;;  %3273 = vmatprep.subr.bf16.mxu1 %v3272_v5  ;;  %3305 = vmatprep.subr.bf16.mxu0 %v3304_v6  ;;  %v718_v5 = vld [vmem:[%s4889_s2 + $0x4b0] sm:$0xff]  ;;  %v3290_v13 = vpack.c.bf16 %v728_v0, %v716_v62  ;;  %v3366_v0 = vpack.c.bf16 %v614_v56, %v602_v55 }
 0x174   : > { %837 = vmatmul.mubr.f32.gmra.mrb[4].mxu1 %v3887_v4  ;;  %998 = vmatmul.mubr.f32.gmra.mrb[20].mxu0 %v3887_v4  ;;  %v730_v6 = vld [vmem:[%s4889_s2 + $0x510] sm:$0xff] }
 0x175   : > { %842 = vmatprep.mubr.f32.mxu1 %v3472_v7  ;;  %1003 = vmatprep.mubr.f32.mxu0 %v3472_v7  ;;  %v674_v41 = vld [vmem:[%s4889_s2 + $0x350] sm:$0xff] }
 0x176   : > { %v3943_v30 = vpop.f32.mrb[6].mxu0  ;;  %3275 = vmatpush1.bf16.msra.mxu1 %v3274_v15  ;;  %3307 = vmatpush1.bf16.msra.mxu0 %v3306_v16  ;;  %v3322_v15 = vpack.c.bf16 %v730_v6, %v718_v5  ;;  %v740_v16 = vld [vmem:[%s4889_s2 + $0x560] sm:$0xff]  ;;  %v3336_v5 = vpack.c.bf16 %v637_v58, %v625_v57  ;;  %v686_v42 = vld [vmem:[%s4889_s2 + $0x3b0] sm:$0xff] }
 0x177   : > { %v3951_v35 = vpop.f32.mrb[7].mxu0  ;;  %3277 = vmatprep.subr.bf16.mxu1 %v3276_v22  ;;  %3309 = vmatprep.subr.bf16.mxu0 %v3308_v23  ;;  %v3292_v22 = vpack.c.bf16 %v753_v9, %v741_v8  ;;  %v3324_v23 = vpack.c.bf16 %v755_v11, %v743_v10  ;;  %v626_v8 = vld [vmem:[%s4889_s2 + $0x1d0] sm:$0xff]  ;;  %v649_v10 = vld [vmem:[%s4889_s2 + $0x288] sm:$0xff] }
 0x178   : > { %843 = vmatmul.mubr.f32.gmra.mrb[6].mxu1 %v3878_v63  ;;  %1004 = vmatmul.mubr.f32.gmra.mrb[22].mxu0 %v3878_v63  ;;  %v638_v9 = vld [vmem:[%s4889_s2 + $0x230] sm:$0xff]  ;;  %v661_v11 = vld [vmem:[%s4889_s2 + $0x2e8] sm:$0xff] }
 0x179   : > { %848 = vmatprep.mubr.f32.mxu1 %v3472_v7  ;;  %1009 = vmatprep.mubr.f32.mxu0 %v3472_v7  ;;  %v3340_v24 = vpack.c.bf16 %v661_v11, %v649_v10  ;;  %v698_v57 = vld [vmem:[%s4889_s2 + $0x410] sm:$0xff] }
 0x17a   : > { %v3975_v43 = vpop.f32.mrb[8].mxu0  ;;  %3279 = vmatpush1.bf16.msra.mxu1 %v3278_v31  ;;  %3311 = vmatpush1.bf16.msra.mxu0 %v3310_v32  ;;  %v3294_v32 = vpack.c.bf16 %v752_v17, %v740_v16  ;;  %v3370_v17 = vpack.c.bf16 %v638_v9, %v626_v8  ;;  %v710_v58 = vld [vmem:[%s4889_s2 + $0x470] sm:$0xff] }
 0x17b   : > { %v3983_v48 = vpop.f32.mrb[9].mxu0  ;;  %3281 = vmatprep.subr.bf16.mxu1 %v3280_v36  ;;  %3313 = vmatprep.subr.bf16.mxu0 %v3312_v19  ;;  %v3328_v36 = vpack.c.bf16 %v589_v27, %v577_v26  ;;  %v3360_v19 = vpack.c.bf16 %v591_v29, %v579_v28  ;;  %v650_v26 = vld [vmem:[%s4889_s2 + $0x290] sm:$0xff]  ;;  %v673_v28 = vld [vmem:[%s4889_s2 + $0x348] sm:$0xff] }
 0x17c   : > { %849 = vmatmul.mubr.f32.gmra.mrb[8].mxu1 %v3919_v21  ;;  %1010 = vmatmul.mubr.f32.gmra.mrb[24].mxu0 %v3919_v21  ;;  %v662_v27 = vld [vmem:[%s4889_s2 + $0x2f0] sm:$0xff]  ;;  %v685_v29 = vld [vmem:[%s4889_s2 + $0x3a8] sm:$0xff] }
 0x17d   : > { %854 = vmatprep.mubr.f32.mxu1 %v3472_v7  ;;  %1015 = vmatprep.mubr.f32.mxu0 %v3472_v7  ;;  %v3344_v39 = vpack.c.bf16 %v685_v29, %v673_v28  ;;  %v722_v10 = vld [vmem:[%s4889_s2 + $0x4d0] sm:$0xff] }
 0x17e   : > { %v4007_v59 = vpop.f32.mrb[10].mxu0  ;;  %3283 = vmatpush1.bf16.msra.mxu1 %v3282_v44  ;;  %3315 = vmatpush1.bf16.msra.mxu0 %v3314_v45  ;;  %v603_v44 = vld [vmem:[%s4889_s2 + $0x118] sm:$0xff]  ;;  %v734_v11 = vld [vmem:[%s4889_s2 + $0x530] sm:$0xff] }
 0x17f   : > { %v4015_v1 = vpop.f32.mrb[11].mxu0  ;;  %3285 = vmatprep.subr.bf16.mxu1 %v3284_v49  ;;  %3317 = vmatprep.subr.bf16.mxu0 %v3316_v51  ;;  %v615_v45 = vld [vmem:[%s4889_s2 + $0x178] sm:$0xff]  ;;  %v600_v49 = vld [vmem:[%s4889_s2 + $0x100] sm:$0xff]  ;;  %v746_v28 = vld [vmem:[%s4889_s2 + $0x590] sm:$0xff] }
 0x180   : > { %855 = vmatmul.mubr.f32.gmra.mrb[10].mxu1 %v3911_v14  ;;  %1016 = vmatmul.mubr.f32.gmra.mrb[26].mxu0 %v3911_v14  ;;  %v612_v51 = vld [vmem:[%s4889_s2 + $0x160] sm:$0xff]  ;;  %v3364_v53 = vpack.c.bf16 %v615_v45, %v603_v44  ;;  %v697_v44 = vld [vmem:[%s4889_s2 + $0x408] sm:$0xff]  ;;  %v758_v29 = vld [vmem:[%s4889_s2 + $0x5f0] sm:$0xff] }
 0x181   : > { %860 = vmatprep.mubr.f32.mxu1 %v3472_v7  ;;  %1021 = vmatprep.mubr.f32.mxu0 %v3472_v7  ;;  %v3334_v62 = vpack.c.bf16 %v612_v51, %v600_v49  ;;  %v709_v45 = vld [vmem:[%s4889_s2 + $0x468] sm:$0xff]  ;;  %v3346_v49 = vpack.c.bf16 %v684_v38, %v672_v37  ;;  %v3378_v51 = vpack.c.bf16 %v686_v42, %v674_v41  ;;  %v4461_v42 = vld [vmem:[%s4890_s3] sm:$0x7] }
 0x182   : > { %v4039_v12 = vpop.f32.mrb[12].mxu0  ;;  %3287 = vmatpush1.bf16.msra.mxu1 %v3286_v60  ;;  %3319 = vmatpush1.bf16.msra.mxu0 %v3318_v61  ;;  %v627_v60 = vld [vmem:[%s4889_s2 + $0x1d8] sm:$0xff]  ;;  %v3348_v55 = vpack.c.bf16 %v709_v45, %v697_v44 }
 0x183   : > { %v4047_v20 = vpop.f32.mrb[13].mxu0  ;;  %3289 = vmatprep.subr.bf16.mxu1 %v3288_v2  ;;  %3321 = vmatprep.subr.bf16.mxu0 %v3320_v3  ;;  %v639_v61 = vld [vmem:[%s4889_s2 + $0x238] sm:$0xff]  ;;  %v624_v2 = vld [vmem:[%s4889_s2 + $0x1c0] sm:$0xff] }
 0x184   : > { %861 = vmatmul.mubr.f32.gmra.mrb[12].mxu1 %v3951_v35  ;;  %1022 = vmatmul.mubr.f32.gmra.mrb[28].mxu0 %v3951_v35  ;;  %v636_v3 = vld [vmem:[%s4889_s2 + $0x220] sm:$0xff]  ;;  %v3368_v6 = vpack.c.bf16 %v639_v61, %v627_v60  ;;  %v721_v60 = vld [vmem:[%s4889_s2 + $0x4c8] sm:$0xff] }
 0x185   : > { %866 = vmatprep.mubr.f32.mxu1 %v3472_v7  ;;  %1027 = vmatprep.mubr.f32.mxu0 %v3472_v7  ;;  %v3338_v16 = vpack.c.bf16 %v636_v3, %v624_v2  ;;  %v733_v61 = vld [vmem:[%s4889_s2 + $0x528] sm:$0xff]  ;;  %v3382_v3 = vpack.c.bf16 %v710_v58, %v698_v57  ;;  %v2747_v57 = vld [vmem:[%s4891_s4 + $0x38] sm:$0xff] }
 0x186   : > { %v4071_v31 = vpop.f32.mrb[14].mxu0  ;;  %3291 = vmatpush1.bf16.msra.mxu1 %v3290_v13  ;;  %3323 = vmatpush1.bf16.msra.mxu0 %v3322_v15  ;;  %v651_v13 = vld [vmem:[%s4889_s2 + $0x298] sm:$0xff]  ;;  %v3352_v8 = vpack.c.bf16 %v733_v61, %v721_v60 }
 0x187   : > { %v4073_v34 = vpop.f32.mrb[15].mxu0  ;;  %3293 = vmatprep.subr.bf16.mxu1 %v3292_v22  ;;  %3325 = vmatprep.subr.bf16.mxu0 %v3324_v23  ;;  %v663_v15 = vld [vmem:[%s4889_s2 + $0x2f8] sm:$0xff]  ;;  %v648_v22 = vld [vmem:[%s4889_s2 + $0x280] sm:$0xff] }
 0x188   : > { %867 = vmatmul.mubr.f32.gmra.mrb[14].mxu1 %v3943_v30  ;;  %1028 = vmatmul.mubr.f32.gmra.mrb[30].mxu0 %v3943_v30  ;;  %v660_v23 = vld [vmem:[%s4889_s2 + $0x2e0] sm:$0xff]  ;;  %v3372_v25 = vpack.c.bf16 %v663_v15, %v651_v13  ;;  %v745_v13 = vld [vmem:[%s4889_s2 + $0x588] sm:$0xff] }
 0x189   : > { %872 = vmatprep.mubr.f32.mxu1 %v3472_v7  ;;  %1033 = vmatprep.mubr.f32.mxu0 %v3472_v7  ;;  %v757_v15 = vld [vmem:[%s4889_s2 + $0x5e8] sm:$0xff] }
 0x18a   : > { %3295 = vmatpush1.bf16.msra.mxu1 %v3294_v32  ;;  %3327 = vmatpush1.bf16.msra.mxu0 %v3326_v33  ;;  %v675_v32 = vld [vmem:[%s4889_s2 + $0x358] sm:$0xff] }
 0x18b   : > { %3329 = vmatprep.subr.bf16.mxu1 %v3328_v36  ;;  %3361 = vmatprep.subr.bf16.mxu0 %v3360_v19  ;;  %v687_v33 = vld [vmem:[%s4889_s2 + $0x3b8] sm:$0xff]  ;;  %v3342_v36 = vpack.c.bf16 %v660_v23, %v648_v22  ;;  %v3374_v19 = vpack.c.bf16 %v662_v27, %v650_v26  ;;  %v3386_v23 = vpack.c.bf16 %v734_v11, %v722_v10  ;;  %v756_v26 = vld [vmem:[%s4889_s2 + $0x5e0] sm:$0xff] }
 0x18c   : > { %873 = vmatmul.mubr.f32.gmra.mrb[16].mxu1 %v3983_v48  ;;  %1034 = vmatmul.mubr.f32.gmra.mrb[32].mxu0 %v3983_v48  ;;  %v3376_v40 = vpack.c.bf16 %v687_v33, %v675_v32  ;;  %v3390_v33 = vpack.c.bf16 %v758_v29, %v746_v28  ;;  %v2766_v28 = vld [vmem:[%s4891_s4 + $0xd0] sm:$0xff]  ;;  %v2767_v29 = vld [vmem:[%s4891_s4 + $0xd8] sm:$0xff] }
 0x18d   : > { %878 = vmatprep.mubr.f32.mxu1 %v3472_v7  ;;  %1039 = vmatprep.mubr.f32.mxu0 %v3472_v7 }
 0x190   : > { %879 = vmatmul.mubr.f32.gmra.mrb[18].mxu1 %v3975_v43  ;;  %1040 = vmatmul.mubr.f32.gmra.mrb[34].mxu0 %v3975_v43 }
 0x191   : > { %884 = vmatprep.mubr.f32.mxu1 %v3472_v7  ;;  %1045 = vmatprep.mubr.f32.mxu0 %v3472_v7 }
 0x194   : > { %885 = vmatmul.mubr.f32.gmra.mrb[20].mxu1 %v4015_v1  ;;  %1046 = vmatmul.mubr.f32.gmra.mrb[36].mxu0 %v4015_v1 }
 0x195   : > { %890 = vmatprep.mubr.f32.mxu1 %v3472_v7  ;;  %1051 = vmatprep.mubr.f32.mxu0 %v3472_v7 }
 0x198   : > { %891 = vmatmul.mubr.f32.gmra.mrb[22].mxu1 %v4007_v59  ;;  %1052 = vmatmul.mubr.f32.gmra.mrb[38].mxu0 %v4007_v59 }
 0x199   : > { %896 = vmatprep.mubr.f32.mxu1 %v3472_v7  ;;  %1057 = vmatprep.mubr.f32.mxu0 %v3472_v7 }
 0x19c   : > { %897 = vmatmul.mubr.f32.gmra.mrb[24].mxu1 %v4047_v20  ;;  %1058 = vmatmul.mubr.f32.gmra.mrb[40].mxu0 %v4047_v20 }
 0x19d   : > { %902 = vmatprep.mubr.f32.mxu1 %v3472_v7  ;;  %1063 = vmatprep.mubr.f32.mxu0 %v3472_v7 }
 0x1a0   : > { %903 = vmatmul.mubr.f32.gmra.mrb[26].mxu1 %v4039_v12  ;;  %1064 = vmatmul.mubr.f32.gmra.mrb[42].mxu0 %v4039_v12 }
 0x1a1   : > { %908 = vmatprep.mubr.f32.mxu1 %v3472_v7  ;;  %1069 = vmatprep.mubr.f32.mxu0 %v3472_v7 }
 0x1a4   : > { %909 = vmatmul.mubr.f32.gmra.mrb[28].mxu1 %v4073_v34  ;;  %1070 = vmatmul.mubr.f32.gmra.mrb[44].mxu0 %v4073_v34 }
 0x1a5   : > { %914 = vmatprep.mubr.f32.mxu1 %v3472_v7  ;;  %1075 = vmatprep.mubr.f32.mxu0 %v3472_v7 }
 0x1a8   : > { %915 = vmatmul.mubr.f32.gmra.mrb[30].mxu1 %v4071_v31  ;;  %1076 = vmatmul.mubr.f32.gmra.mrb[46].mxu0 %v4071_v31 }
 0x1a9   : > { %1146 = vmatprep.mubr.f32.mxu1 %v3472_v7  ;;  %1307 = vmatprep.mubr.f32.mxu0 %v3472_v7 }
 0x1ac   : > { %1147 = vmatmul.mubr.f32.vlgmr.msra.gmra.mrb[32].mxu1 %v3855_v54  ;;  %1308 = vmatmul.mubr.f32.vlgmr.msra.gmra.mrb[48].mxu0 %v3855_v54 }
 0x1ad   : > { %3331 = vmatpush1.bf16.msra.mxu1 %v3330_v46  ;;  %1152 = vmatprep.mubr.f32.mxu1 %v3472_v7  ;;  %v699_v46 = vld [vmem:[%s4889_s2 + $0x418] sm:$0xff] }
 0x1ae   : > { %1313 = vmatprep.mubr.f32.mxu0 %v3472_v7  ;;  %3363 = vmatpush1.bf16.msra.mxu0 %v3362_v47  ;;  %v711_v47 = vld [vmem:[%s4889_s2 + $0x478] sm:$0xff] }
 0x1af   : > { %3333 = vmatprep.subr.bf16.mxu1 %v3332_v52  ;;  %3365 = vmatprep.subr.bf16.mxu0 %v3364_v53  ;;  %v696_v52 = vld [vmem:[%s4889_s2 + $0x400] sm:$0xff]  ;;  %v3380_v56 = vpack.c.bf16 %v711_v47, %v699_v46  ;;  %v2762_v46 = vld [vmem:[%s4891_s4 + $0xb0] sm:$0xff]  ;;  %v2763_v47 = vld [vmem:[%s4891_s4 + $0xb8] sm:$0xff] }
 0x1b0   : > { %1153 = vmatmul.mubr.f32.gmra.mrb[34].mxu1 %v3847_v50  ;;  %1314 = vmatmul.mubr.f32.gmra.mrb[50].mxu0 %v3847_v50  ;;  %v708_v53 = vld [vmem:[%s4889_s2 + $0x460] sm:$0xff] }
 0x1b1   : > { %1158 = vmatprep.mubr.f32.mxu1 %v3472_v7  ;;  %1319 = vmatprep.mubr.f32.mxu0 %v3472_v7  ;;  %v3350_v2 = vpack.c.bf16 %v708_v53, %v696_v52 }
 0x1b2   : > { %3335 = vmatpush1.bf16.msra.mxu1 %v3334_v62  ;;  %3367 = vmatpush1.bf16.msra.mxu0 %v3366_v0  ;;  %v723_v62 = vld [vmem:[%s4889_s2 + $0x4d8] sm:$0xff] }
 0x1b3   : > { %3337 = vmatprep.subr.bf16.mxu1 %v3336_v5  ;;  %3369 = vmatprep.subr.bf16.mxu0 %v3368_v6  ;;  %v735_v0 = vld [vmem:[%s4889_s2 + $0x538] sm:$0xff]  ;;  %v720_v5 = vld [vmem:[%s4889_s2 + $0x4c0] sm:$0xff] }
 0x1b4   : > { %1159 = vmatmul.mubr.f32.gmra.mrb[36].mxu1 %v3887_v4  ;;  %1320 = vmatmul.mubr.f32.gmra.mrb[52].mxu0 %v3887_v4  ;;  %v732_v6 = vld [vmem:[%s4889_s2 + $0x520] sm:$0xff]  ;;  %v3384_v9 = vpack.c.bf16 %v735_v0, %v723_v62 }
 0x1b5   : > { %1164 = vmatprep.mubr.f32.mxu1 %v3472_v7  ;;  %1325 = vmatprep.mubr.f32.mxu0 %v3472_v7  ;;  %v3354_v22 = vpack.c.bf16 %v732_v6, %v720_v5 }
 0x1b6   : > { %3339 = vmatpush1.bf16.msra.mxu1 %v3338_v16  ;;  %3371 = vmatpush1.bf16.msra.mxu0 %v3370_v17  ;;  %v747_v16 = vld [vmem:[%s4889_s2 + $0x598] sm:$0xff] }
 0x1b7   : > { %3341 = vmatprep.subr.bf16.mxu1 %v3340_v24  ;;  %3373 = vmatprep.subr.bf16.mxu0 %v3372_v25  ;;  %v759_v17 = vld [vmem:[%s4889_s2 + $0x5f8] sm:$0xff]  ;;  %v744_v24 = vld [vmem:[%s4889_s2 + $0x580] sm:$0xff]  ;;  %v3356_v25 = vpack.c.bf16 %v757_v15, %v745_v13 }
 0x1b8   : > { %1165 = vmatmul.mubr.f32.gmra.mrb[38].mxu1 %v3878_v63  ;;  %1326 = vmatmul.mubr.f32.gmra.mrb[54].mxu0 %v3878_v63  ;;  %v3388_v27 = vpack.c.bf16 %v759_v17, %v747_v16  ;;  %v3358_v32 = vpack.c.bf16 %v756_v26, %v744_v24  ;;  %v2748_v16 = vld [vmem:[%s4891_s4 + $0x40] sm:$0xff]  ;;  %v2749_v17 = vld [vmem:[%s4891_s4 + $0x48] sm:$0xff] }
 0x1b9   : > { %1170 = vmatprep.mubr.f32.mxu1 %v3472_v7  ;;  %1331 = vmatprep.mubr.f32.mxu0 %v3472_v7 }
 0x1ba   : > { %3343 = vmatpush1.bf16.msra.mxu1 %v3342_v36  ;;  %3375 = vmatpush1.bf16.msra.mxu0 %v3374_v19  ;;  %v2761_v36 = vld [vmem:[%s4891_s4 + $0xa8] sm:$0xff] }
 0x1bb   : > { %3345 = vmatprep.subr.bf16.mxu1 %v3344_v39  ;;  %3377 = vmatprep.subr.bf16.mxu0 %v3376_v40  ;;  %v2745_v39 = vld [vmem:[%s4891_s4 + $0x28] sm:$0xff] }
 0x1bc   : > { %1171 = vmatmul.mubr.f32.gmra.mrb[40].mxu1 %v3919_v21  ;;  %1332 = vmatmul.mubr.f32.gmra.mrb[56].mxu0 %v3919_v21 }
 0x1bd   : > { %1176 = vmatprep.mubr.f32.mxu1 %v3472_v7  ;;  %1337 = vmatprep.mubr.f32.mxu0 %v3472_v7 }
 0x1be   : > { %3347 = vmatpush1.bf16.msra.mxu1 %v3346_v49  ;;  %3379 = vmatpush1.bf16.msra.mxu0 %v3378_v51 }
 0x1bf   : > { %3349 = vmatprep.subr.bf16.mxu1 %v3348_v55  ;;  %3381 = vmatprep.subr.bf16.mxu0 %v3380_v56  ;;  %v3404_v55 = vpack.c.bf16 %v2763_v47, %v2762_v46  ;;  %v2746_v56 = vld [vmem:[%s4891_s4 + $0x30] sm:$0xff]  ;;  %v2752_v46 = vld [vmem:[%s4891_s4 + $0x60] sm:$0xff]  ;;  %v2753_v47 = vld [vmem:[%s4891_s4 + $0x68] sm:$0xff] }
 0x1c0   : > { %1177 = vmatmul.mubr.f32.gmra.mrb[42].mxu1 %v3911_v14  ;;  %1338 = vmatmul.mubr.f32.gmra.mrb[58].mxu0 %v3911_v14  ;;  %v3406_v61 = vpack.c.bf16 %v2747_v57, %v2746_v56 }
 0x1c1   : > { %1182 = vmatprep.mubr.f32.mxu1 %v3472_v7  ;;  %1343 = vmatprep.mubr.f32.mxu0 %v3472_v7 }
 0x1c2   : > { %3351 = vmatpush1.bf16.msra.mxu1 %v3350_v2  ;;  %3383 = vmatpush1.bf16.msra.mxu0 %v3382_v3 }
 0x1c3   : > { %3353 = vmatprep.subr.bf16.mxu1 %v3352_v8  ;;  %3385 = vmatprep.subr.bf16.mxu0 %v3384_v9  ;;  %v2764_v8 = vld [vmem:[%s4891_s4 + $0xc0] sm:$0xff]  ;;  %v2765_v9 = vld [vmem:[%s4891_s4 + $0xc8] sm:$0xff] }
 0x1c4   : > { %1183 = vmatmul.mubr.f32.gmra.mrb[44].mxu1 %v3951_v35  ;;  %1344 = vmatmul.mubr.f32.gmra.mrb[60].mxu0 %v3951_v35  ;;  %v3408_v15 = vpack.c.bf16 %v2765_v9, %v2764_v8 }
 0x1c5   : > { %1188 = vmatprep.mubr.f32.mxu1 %v3472_v7  ;;  %1349 = vmatprep.mubr.f32.mxu0 %v3472_v7 }
 0x1c6   : > { %3355 = vmatpush1.bf16.msra.mxu1 %v3354_v22  ;;  %3387 = vmatpush1.bf16.msra.mxu0 %v3386_v23  ;;  %v3410_v23 = vpack.c.bf16 %v2749_v17, %v2748_v16 }
 0x1c7   : > { %3357 = vmatprep.subr.bf16.mxu1 %v3356_v25  ;;  %3389 = vmatprep.subr.bf16.mxu0 %v3388_v27 }
 0x1c8   : > { %1189 = vmatmul.mubr.f32.gmra.mrb[46].mxu1 %v3943_v30  ;;  %1350 = vmatmul.mubr.f32.gmra.mrb[62].mxu0 %v3943_v30 }
 0x1c9   : > { %1194 = vmatprep.mubr.f32.mxu1 %v3472_v7  ;;  %1355 = vmatprep.mubr.f32.mxu0 %v3472_v7 }
 0x1ca   : > { %3359 = vmatpush1.bf16.msra.mxu1 %v3358_v32  ;;  %3391 = vmatpush1.bf16.msra.mxu0 %v3390_v33 }
 0x1cc   : > { %1195 = vmatmul.mubr.f32.gmra.mrb[48].mxu1 %v3983_v48  ;;  %1356 = vmatmul.mubr.f32.gmra.mrb[64].mxu0 %v3983_v48 }
 0x1cd   : > { %1200 = vmatprep.mubr.f32.mxu1 %v3472_v7  ;;  %1361 = vmatprep.mubr.f32.mxu0 %v3472_v7 }
 0x1d0   : > { %1201 = vmatmul.mubr.f32.gmra.mrb[50].mxu1 %v3975_v43  ;;  %1362 = vmatmul.mubr.f32.gmra.mrb[66].mxu0 %v3975_v43 }
 0x1d1   : > { %1206 = vmatprep.mubr.f32.mxu1 %v3472_v7  ;;  %1367 = vmatprep.mubr.f32.mxu0 %v3472_v7 }
 0x1d4   : > { %1207 = vmatmul.mubr.f32.gmra.mrb[52].mxu1 %v4015_v1  ;;  %1368 = vmatmul.mubr.f32.gmra.mrb[68].mxu0 %v4015_v1 }
 0x1d5   : > { %1212 = vmatprep.mubr.f32.mxu1 %v3472_v7  ;;  %1373 = vmatprep.mubr.f32.mxu0 %v3472_v7 }
 0x1d8   : > { %1213 = vmatmul.mubr.f32.gmra.mrb[54].mxu1 %v4007_v59  ;;  %1374 = vmatmul.mubr.f32.gmra.mrb[70].mxu0 %v4007_v59 }
 0x1d9   : > { %1218 = vmatprep.mubr.f32.mxu1 %v3472_v7  ;;  %1379 = vmatprep.mubr.f32.mxu0 %v3472_v7 }
 0x1dc   : > { %1219 = vmatmul.mubr.f32.gmra.mrb[56].mxu1 %v4047_v20  ;;  %1380 = vmatmul.mubr.f32.gmra.mrb[72].mxu0 %v4047_v20 }
 0x1dd   : > { %1224 = vmatprep.mubr.f32.mxu1 %v3472_v7  ;;  %1385 = vmatprep.mubr.f32.mxu0 %v3472_v7 }
 0x1e0   : > { %1225 = vmatmul.mubr.f32.gmra.mrb[58].mxu1 %v4039_v12  ;;  %1386 = vmatmul.mubr.f32.gmra.mrb[74].mxu0 %v4039_v12 }
 0x1e1   : > { %1230 = vmatprep.mubr.f32.mxu1 %v3472_v7  ;;  %1391 = vmatprep.mubr.f32.mxu0 %v3472_v7 }
 0x1e4   : > { %1231 = vmatmul.mubr.f32.gmra.mrb[60].mxu1 %v4073_v34  ;;  %1392 = vmatmul.mubr.f32.gmra.mrb[76].mxu0 %v4073_v34 }
 0x1e5   : > { %1236 = vmatprep.mubr.f32.mxu1 %v3472_v7  ;;  %1397 = vmatprep.mubr.f32.mxu0 %v3472_v7 }
 0x1e8   : > { %1237 = vmatmul.mubr.f32.gmra.mrb[62].mxu1 %v4071_v31  ;;  %1398 = vmatmul.mubr.f32.gmra.mrb[78].mxu0 %v4071_v31 }
 0x1e9   : > { %1468 = vmatprep.mubr.f32.mxu1 %v3472_v7  ;;  %1629 = vmatprep.mubr.f32.mxu0 %v3472_v7 }
 0x1ec   : > { %1469 = vmatmul.mubr.f32.vlgmr.msra.gmra.mrb[64].mxu1 %v3855_v54  ;;  %1630 = vmatmul.mubr.f32.vlgmr.msra.gmra.mrb[80].mxu0 %v3855_v54  ;;  %v2757_v54 = vld [vmem:[%s4891_s4 + $0x88] sm:$0xff] }
 0x1ed   : > { %1474 = vmatprep.mubr.f32.mxu1 %v3472_v7  ;;  %1635 = vmatprep.mubr.f32.mxu0 %v3472_v7 }
 0x1f0   : > { %1475 = vmatmul.mubr.f32.gmra.mrb[66].mxu1 %v3847_v50  ;;  %1636 = vmatmul.mubr.f32.gmra.mrb[82].mxu0 %v3847_v50  ;;  %v2756_v50 = vld [vmem:[%s4891_s4 + $0x80] sm:$0xff] }
 0x1f1   : > { %1480 = vmatprep.mubr.f32.mxu1 %v3472_v7  ;;  %1641 = vmatprep.mubr.f32.mxu0 %v3472_v7 }
 0x1f4   : > { %1481 = vmatmul.mubr.f32.gmra.mrb[68].mxu1 %v3887_v4  ;;  %1642 = vmatmul.mubr.f32.gmra.mrb[84].mxu0 %v3887_v4  ;;  %v2740_v4 = vld [vmem:[%s4891_s4] sm:$0xff] }
 0x1f5   : > { %1486 = vmatprep.mubr.f32.mxu1 %v3472_v7  ;;  %1647 = vmatprep.mubr.f32.mxu0 %v3472_v7 }
 0x1f8   : > { %1487 = vmatmul.mubr.f32.gmra.mrb[70].mxu1 %v3878_v63  ;;  %1648 = vmatmul.mubr.f32.gmra.mrb[86].mxu0 %v3878_v63  ;;  %v3392_v63 = vpack.c.bf16 %v2757_v54, %v2756_v50 }
 0x1f9   : > { %1492 = vmatprep.mubr.f32.mxu1 %v3472_v7  ;;  %1653 = vmatprep.mubr.f32.mxu0 %v3472_v7 }
 0x1fa   : > { %3393 = vmatprep.subr.bf16.mxu1 %v3392_v63 }
 0x1fc   : > { %1493 = vmatmul.mubr.f32.gmra.mrb[72].mxu1 %v3919_v21  ;;  %1654 = vmatmul.mubr.f32.gmra.mrb[88].mxu0 %v3919_v21 }
 0x1fd   : > { %1498 = vmatprep.mubr.f32.mxu1 %v3472_v7  ;;  %1659 = vmatprep.mubr.f32.mxu0 %v3472_v7 }
 0x200   : > { %1499 = vmatmul.mubr.f32.gmra.mrb[74].mxu1 %v3911_v14  ;;  %1660 = vmatmul.mubr.f32.gmra.mrb[90].mxu0 %v3911_v14  ;;  %v2741_v14 = vld [vmem:[%s4891_s4 + $0x8] sm:$0xff] }
 0x201   : > { %1504 = vmatprep.mubr.f32.mxu1 %v3472_v7  ;;  %1665 = vmatprep.mubr.f32.mxu0 %v3472_v7  ;;  %v3394_v21 = vpack.c.bf16 %v2741_v14, %v2740_v4  ;;  %v3412_v4 = vpack.c.bf16 %v2767_v29, %v2766_v28  ;;  %v2750_v14 = vld [vmem:[%s4891_s4 + $0x50] sm:$0xff] }
 0x203   : > { %3395 = vmatpush3.bf16.msra.mxu1 %v3394_v21  ;;  %v2751_v21 = vld [vmem:[%s4891_s4 + $0x58] sm:$0xff] }
 0x204   : > { %1505 = vmatmul.mubr.f32.gmra.mrb[76].mxu1 %v3951_v35  ;;  %1666 = vmatmul.mubr.f32.gmra.mrb[92].mxu0 %v3951_v35  ;;  %v2759_v35 = vld [vmem:[%s4891_s4 + $0x98] sm:$0xff] }
 0x205   : > { %1510 = vmatprep.mubr.f32.mxu1 %v3472_v7  ;;  %1671 = vmatprep.mubr.f32.mxu0 %v3472_v7 }
 0x208   : > { %1511 = vmatmul.mubr.f32.gmra.mrb[78].mxu1 %v3943_v30  ;;  %1672 = vmatmul.mubr.f32.gmra.mrb[94].mxu0 %v3943_v30  ;;  %v2758_v30 = vld [vmem:[%s4891_s4 + $0x90] sm:$0xff] }
 0x209   : > { %1516 = vmatprep.mubr.f32.mxu1 %v3472_v7  ;;  %1677 = vmatprep.mubr.f32.mxu0 %v3472_v7 }
 0x20c   : > { %1517 = vmatmul.mubr.f32.gmra.mrb[80].mxu1 %v3983_v48  ;;  %1678 = vmatmul.mubr.f32.gmra.mrb[96].mxu0 %v3983_v48  ;;  %v2742_v48 = vld [vmem:[%s4891_s4 + $0x10] sm:$0xff] }
 0x20d   : > { %1522 = vmatprep.mubr.f32.mxu1 %v3472_v7  ;;  %1683 = vmatprep.mubr.f32.mxu0 %v3472_v7 }
 0x210   : > { %1523 = vmatmul.mubr.f32.gmra.mrb[82].mxu1 %v3975_v43  ;;  %1684 = vmatmul.mubr.f32.gmra.mrb[98].mxu0 %v3975_v43  ;;  %v3396_v43 = vpack.c.bf16 %v2759_v35, %v2758_v30 }
 0x211   : > { %1528 = vmatprep.mubr.f32.mxu1 %v3472_v7  ;;  %1689 = vmatprep.mubr.f32.mxu0 %v3472_v7 }
 0x212   : > { %3397 = vmatprep.subr.bf16.mxu1 %v3396_v43 }
 0x214   : > { %1529 = vmatmul.mubr.f32.gmra.mrb[84].mxu1 %v4015_v1  ;;  %1690 = vmatmul.mubr.f32.gmra.mrb[100].mxu0 %v4015_v1 }
 0x215   : > { %1534 = vmatprep.mubr.f32.mxu1 %v3472_v7  ;;  %1695 = vmatprep.mubr.f32.mxu0 %v3472_v7 }
 0x218   : > { %1535 = vmatmul.mubr.f32.gmra.mrb[86].mxu1 %v4007_v59  ;;  %1696 = vmatmul.mubr.f32.gmra.mrb[102].mxu0 %v4007_v59  ;;  %v2743_v59 = vld [vmem:[%s4891_s4 + $0x18] sm:$0xff] }
 0x219   : > { %1540 = vmatprep.mubr.f32.mxu1 %v3472_v7  ;;  %1701 = vmatprep.mubr.f32.mxu0 %v3472_v7  ;;  %v3398_v1 = vpack.c.bf16 %v2743_v59, %v2742_v48  ;;  %v3414_v48 = vpack.c.bf16 %v2751_v21, %v2750_v14 }
 0x21b   : > { %3399 = vmatpush3.bf16.msra.mxu1 %v3398_v1 }
 0x21c   : > { %1541 = vmatmul.mubr.f32.gmra.mrb[88].mxu1 %v4047_v20  ;;  %1702 = vmatmul.mubr.f32.gmra.mrb[104].mxu0 %v4047_v20 }
 0x21d   : > { %1546 = vmatprep.mubr.f32.mxu1 %v3472_v7  ;;  %1707 = vmatprep.mubr.f32.mxu0 %v3472_v7 }
 0x220   : > { %1547 = vmatmul.mubr.f32.gmra.mrb[90].mxu1 %v4039_v12  ;;  %1708 = vmatmul.mubr.f32.gmra.mrb[106].mxu0 %v4039_v12  ;;  %v1875_v12 = vshrl.u32 %v268_v18, 7  ;;  %v2744_v18 = vld [vmem:[%s4891_s4 + $0x20] sm:$0xff] }
 0x221   : > { %1552 = vmatprep.mubr.f32.mxu1 %v3472_v7  ;;  %1713 = vmatprep.mubr.f32.mxu0 %v3472_v7  ;;  %v3402_v40 = vpack.c.bf16 %v2745_v39, %v2744_v18 }
 0x222   : > { %v4456_v41 = vsub.s32 0, %v1875_v12 }
 0x224   : > { %1553 = vmatmul.mubr.f32.gmra.mrb[92].mxu1 %v4073_v34  ;;  %1714 = vmatmul.mubr.f32.gmra.mrb[108].mxu0 %v4073_v34  ;;  %v2760_v34 = vld [vmem:[%s4891_s4 + $0xa0] sm:$0xff]  ;;  %v4481_v3 = vrot.slane %v4461_v42, %v4456_v41 }
 0x225   : > { %1558 = vmatprep.mubr.f32.mxu1 %v3472_v7  ;;  %1719 = vmatprep.mubr.f32.mxu0 %v3472_v7  ;;  %v3400_v38 = vpack.c.bf16 %v2761_v36, %v2760_v34 }
 0x227   : > { %3401 = vmatprep.subr.bf16.mxu1 %v3400_v38  ;;  %v2769_v38 = vld [vmem:[%s4891_s4 + $0xe8] sm:$0xff] }
 0x228   : > { %1559 = vmatmul.mubr.f32.gmra.mrb[94].mxu1 %v4071_v31  ;;  %1720 = vmatmul.mubr.f32.gmra.mrb[110].mxu0 %v4071_v31 }
 0x229   : > { %3403 = vmatpush3.bf16.msra.mxu1 %v3402_v40  ;;  %3181 = vmatprep.mubr.msk.f32.mxu0 %vm3474_vm11, %v3472_v7 }
 0x22a   : > { %3405 = vmatprep.subr.bf16.mxu1 %v3404_v55 }
 0x22d   : > { %3407 = vmatpush3.bf16.msra.mxu1 %v3406_v61  ;;  %v2770_v61 = vld [vmem:[%s4891_s4 + $0xf0] sm:$0xff] }
 0x22e   : > { %3409 = vmatprep.subr.bf16.mxu1 %v3408_v15 }
 0x231   : > { %3411 = vmatpush3.bf16.msra.mxu1 %v3410_v23 }
 0x232   : > { %3413 = vmatprep.subr.bf16.mxu1 %v3412_v4 }
 0x235   : > { %3415 = vmatpush3.bf16.msra.mxu1 %v3414_v48 }
 0x23f   : > { %v826_v20 = vpop.f32.mrb[0].mxu1  ;;  %v987_v31 = vpop.f32.mrb[16].mxu0 }
 0x240   : > { %v828_v19 = vpop.f32.mrb[1].mxu1  ;;  %v4448_v37 = vpop.f32.mrb[17].mxu0  ;;  %v1817_v49 = vrot.slane %v987_v31, 2 }
 0x241   : > { %v1744_v58 = vrot.slane %v828_v19, 1  ;;  %v2768_v19 = vld [vmem:[%s4891_s4 + $0xe0] sm:$0xff] }
 0x243   : > { %v832_v44 = vpop.f32.mrb[2].mxu1  ;;  %v993_v45 = vpop.f32.mrb[18].mxu0 }
 0x244   : > { %v1818_v51 = vrot.slane %v993_v45, 2  ;;  %v834_v52 = vpop.f32.mrb[3].mxu1  ;;  %v4469_v53 = vpop.f32.mrb[19].mxu0  ;;  %v3416_v45 = vpack.c.bf16 %v2769_v38, %v2768_v19 }
 0x245   : > { %v1745_v60 = vrot.slane %v834_v52, 1 }
 0x246   : > { %v1819_v62 = vsel %vm1816_vm0, %v1817_v49, %v1818_v51  ;;  %3417 = vmatprep.subr.bf16.mxu1 %v3416_v45 }
 0x247   : > { %v1746_v0 = vsel %vm1743_vm2, %v1744_v58, %v1745_v60  ;;  %v1785_v2 = vadd.f32 %v1745_v60, %v832_v44  ;;  %v838_v5 = vpop.f32.mrb[4].mxu1  ;;  %v999_v6 = vpop.f32.mrb[20].mxu0 }
 0x248   : > { %v1784_v10 = vadd.f32 %v1746_v0, %v826_v20  ;;  %v840_v11 = vpop.f32.mrb[5].mxu1  ;;  %v4489_v13 = vpop.f32.mrb[21].mxu0  ;;  %v1820_v33 = vrot.slane %v999_v6, 2 }
 0x249   : > { %v1858_v22 = vadd.f32 %v1818_v51, %v1785_v2  ;;  %v1747_v35 = vrot.slane %v840_v11, 1  ;;  %v3418_v51 = vpack.c.bf16 %v2753_v47, %v2752_v46  ;;  %v2755_v11 = vld [vmem:[%s4891_s4 + $0x78] sm:$0xff] }
 0x24a   : > { %v1857_v24 = vadd.f32 %v1819_v62, %v1784_v10  ;;  %v2771_v62 = vld [vmem:[%s4891_s4 + $0xf8] sm:$0xff]  ;;  %v2754_v10 = vld [vmem:[%s4891_s4 + $0x70] sm:$0xff] }
 0x24b   : > { %v1880_v25 = vadd.f32 %v4481_v3, %v1858_v22  ;;  %v844_v26 = vpop.f32.mrb[6].mxu1  ;;  %v1005_v27 = vpop.f32.mrb[22].mxu0  ;;  %3419 = vmatpush3.bf16.msra.mxu1 %v3418_v51  ;;  %v3420_v9 = vpack.c.bf16 %v2771_v62, %v2770_v61  ;;  %v3422_v22 = vpack.c.bf16 %v2755_v11, %v2754_v10 }
 0x24c   : > { %v1879_v32 = vadd.f32 %v4481_v3, %v1857_v24  ;;  %v1821_v50 = vrot.slane %v1005_v27, 2  ;;  %v846_v54 = vpop.f32.mrb[7].mxu1  ;;  %v4505_v63 = vpop.f32.mrb[23].mxu0 }
 0x24d   : > { %v1896_v30 = vmax.f32 %v1880_v25, 0.0  ;;  %v1748_v43 = vrot.slane %v846_v54, 1  ;;  %3421 = vmatprep.subr.bf16.mxu1 %v3420_v9 }
 0x24e   : > { %v1895_v59 = vmax.f32 %v1879_v32, 0.0  ;;  %v1822_v1 = vsel %vm1816_vm0, %v1820_v33, %v1821_v50 }
 0x24f   : > { %v1911_v12 = vsel %vm1816_vm0, %v1896_v30, -inf  ;;  %v1749_v20 = vsel %vm1743_vm2, %v1747_v35, %v1748_v43  ;;  %v1787_v31 = vadd.f32 %v1748_v43, %v844_v26  ;;  %v850_v34 = vpop.f32.mrb[8].mxu1  ;;  %v1011_v36 = vpop.f32.mrb[24].mxu0  ;;  %3423 = vmatpush3.bf16.msra.mxu1 %v3422_v22 }
 0x250   : > { %v1912_v18 = vmax.f32 %v1895_v59, %v1911_v12  ;;  %v1786_v39 = vadd.f32 %v1749_v20, %v838_v5  ;;  %v852_v40 = vpop.f32.mrb[9].mxu1  ;;  %v4522_v44 = vpop.f32.mrb[25].mxu0  ;;  %v1823_v57 = vrot.slane %v1011_v36, 2 }
 0x251   : > { %v1860_v49 = vadd.f32 %v1821_v50, %v1787_v31  ;;  %v1750_v16 = vrot.slane %v852_v40, 1 }
 0x252   : > { %v1913_v52 = vrot.slane %v1912_v18, 4  ;;  %v1859_v55 = vadd.f32 %v1822_v1, %v1786_v39 }
 0x253   : > { %v1882_v56 = vadd.f32 %v4481_v3, %v1860_v49  ;;  %v856_v58 = vpop.f32.mrb[10].mxu1  ;;  %v1017_v60 = vpop.f32.mrb[26].mxu0 }
 0x254   : > { %v1914_v0 = vmax.f32 %v1912_v18, %v1913_v52  ;;  %v1881_v2 = vadd.f32 %v4481_v3, %v1859_v55  ;;  %v1824_v5 = vrot.slane %v1017_v60, 2  ;;  %v858_v6 = vpop.f32.mrb[11].mxu1  ;;  %v4538_v8 = vpop.f32.mrb[27].mxu0 }
 0x255   : > { %v1898_v15 = vmax.f32 %v1882_v56, 0.0  ;;  %v1751_v17 = vrot.slane %v858_v6, 1 }
 0x256   : > { %v1897_v23 = vmax.f32 %v1881_v2, 0.0  ;;  %v1825_v24 = vsel %vm1816_vm0, %v1823_v57, %v1824_v5  ;;  %v1915_v25 = vrot.slane %v1914_v0, 2 }
 0x257   : > { %v1919_v26 = vsel %vm1816_vm0, %v1898_v15, -inf  ;;  %v1752_v27 = vsel %vm1743_vm2, %v1750_v16, %v1751_v17  ;;  %v1789_v28 = vadd.f32 %v1751_v17, %v856_v58  ;;  %v862_v29 = vpop.f32.mrb[12].mxu1  ;;  %v1023_v32 = vpop.f32.mrb[28].mxu0 }
 0x258   : > { %v1920_v33 = vmax.f32 %v1897_v23, %v1919_v26  ;;  %v1788_v50 = vadd.f32 %v1752_v27, %v850_v34  ;;  %v864_v54 = vpop.f32.mrb[13].mxu1  ;;  %v4549_v4 = vpop.f32.mrb[29].mxu0  ;;  %v1916_v35 = vmax.f32 %v1914_v0, %v1915_v25  ;;  %v1826_v20 = vrot.slane %v1023_v32, 2 }
 0x259   : > { %v1862_v14 = vadd.f32 %v1824_v5, %v1789_v28  ;;  %v1753_v38 = vrot.slane %v864_v54, 1 }
 0x25a   : > { %v1921_v21 = vrot.slane %v1920_v33, 4  ;;  %v1861_v30 = vadd.f32 %v1825_v24, %v1788_v50  ;;  %v1917_v46 = vrot.slane %v1916_v35, 1 }
 0x25b   : > { %v1884_v43 = vadd.f32 %v4481_v3, %v1862_v14  ;;  %v868_v48 = vpop.f32.mrb[14].mxu1  ;;  %v1029_v59 = vpop.f32.mrb[30].mxu0 }
 0x25c   : > { %v1922_v1 = vmax.f32 %v1920_v33, %v1921_v21  ;;  %v1883_v12 = vadd.f32 %v4481_v3, %v1861_v30  ;;  %v1827_v31 = vrot.slane %v1029_v59, 2  ;;  %v870_v36 = vpop.f32.mrb[15].mxu1  ;;  %v4553_v19 = vpop.f32.mrb[31].mxu0  ;;  %v1918_v6 = vmax.f32 %v1916_v35, %v1917_v46 }
 0x25d   : > { %v1900_v34 = vmax.f32 %v1884_v43, 0.0  ;;  %v1754_v18 = vrot.slane %v870_v36, 1 }
 0x25e   : > { %v1923_v39 = vrot.slane %v1922_v1, 2  ;;  %v1899_v40 = vmax.f32 %v1883_v12, 0.0  ;;  %v1828_v45 = vsel %vm1816_vm0, %v1826_v20, %v1827_v31 }
 0x25f   : > { %v1927_v47 = vsel %vm1816_vm0, %v1900_v34, -inf  ;;  %v1755_v49 = vsel %vm1743_vm2, %v1753_v38, %v1754_v18  ;;  %v1791_v51 = vadd.f32 %v1754_v18, %v868_v48  ;;  %v874_v52 = vpop.f32.mrb[16].mxu1  ;;  %v1035_v55 = vpop.f32.mrb[32].mxu0 }
 0x260   : > { %v1924_v56 = vmax.f32 %v1922_v1, %v1923_v39  ;;  %v1928_v57 = vmax.f32 %v1899_v40, %v1927_v47  ;;  %v1790_v58 = vadd.f32 %v1755_v49, %v862_v29  ;;  %v876_v60 = vpop.f32.mrb[17].mxu1  ;;  %v4558_v61 = vpop.f32.mrb[33].mxu0  ;;  %v1829_v10 = vrot.slane %v1035_v55, 2 }
 0x261   : > { %v1864_v62 = vadd.f32 %v1827_v31, %v1791_v51  ;;  %v1756_v27 = vrot.slane %v876_v60, 1 }
 0x262   : > { %v1925_v0 = vrot.slane %v1924_v56, 1  ;;  %v1929_v2 = vrot.slane %v1928_v57, 4  ;;  %v1863_v5 = vadd.f32 %v1828_v45, %v1790_v58 }
 0x263   : > { %v1886_v9 = vadd.f32 %v4481_v3, %v1864_v62  ;;  %v880_v11 = vpop.f32.mrb[18].mxu1  ;;  %v1041_v15 = vpop.f32.mrb[34].mxu0 }
 0x264   : > { %v1926_v16 = vmax.f32 %v1924_v56, %v1925_v0  ;;  %v1930_v17 = vmax.f32 %v1928_v57, %v1929_v2  ;;  %v1885_v22 = vadd.f32 %v4481_v3, %v1863_v5  ;;  %v1830_v23 = vrot.slane %v1041_v15, 2  ;;  %v882_v24 = vpop.f32.mrb[19].mxu1  ;;  %v4562_v25 = vpop.f32.mrb[35].mxu0  ;;  %v2773_v15 = vld [vmem:[%s4891_s4 + $0x108] sm:$0xff] }
 0x265   : > { %v1902_v26 = vmax.f32 %v1886_v9, 0.0  ;;  %v1757_v28 = vrot.slane %v882_v24, 1 }
 0x266   : > { %v1931_v29 = vrot.slane %v1930_v17, 2  ;;  %v1901_v32 = vmax.f32 %v1885_v22, 0.0  ;;  %v1831_v33 = vsel %vm1816_vm0, %v1829_v10, %v1830_v23  ;;  %v2694_v50 = vsel %vm2693_vm3, %v1926_v16, %v1918_v6 }
 0x267   : > { %v1935_v54 = vsel %vm1816_vm0, %v1902_v26, -inf  ;;  %v1758_v14 = vsel %vm1743_vm2, %v1756_v27, %v1757_v28  ;;  %v1793_v21 = vadd.f32 %v1757_v28, %v880_v11  ;;  %v886_v30 = vpop.f32.mrb[20].mxu1  ;;  %v1047_v35 = vpop.f32.mrb[36].mxu0  ;;  %v2772_v11 = vld [vmem:[%s4891_s4 + $0x100] sm:$0xff]  ;;  %v3473_v26 = vmov 0.0|0.0  }
 0x268   : > { %v1932_v43 = vmax.f32 %v1930_v17, %v1931_v29  ;;  %v1936_v48 = vmax.f32 %v1901_v32, %v1935_v54  ;;  %v1792_v59 = vadd.f32 %v1758_v14, %v874_v52  ;;  %v888_v1 = vpop.f32.mrb[21].mxu1  ;;  %v4568_v12 = vpop.f32.mrb[37].mxu0  ;;  %v1832_v18 = vrot.slane %v1047_v35, 2  ;;  %3424 = vmatprep.subr.bf16.mxu0 %v3473_v26 }
 0x269   : > { %v1866_v20 = vadd.f32 %v1830_v23, %v1793_v21  ;;  %v1759_v56 = vrot.slane %v888_v1, 1  ;;  %v3425_v28 = vpack.c.bf16 %v2773_v15, %v2772_v11 }
 0x26a   : > { %v1933_v31 = vrot.slane %v1932_v43, 1  ;;  %v1937_v36 = vrot.slane %v1936_v48, 4  ;;  %v1865_v34 = vadd.f32 %v1831_v33, %v1792_v59 }
 0x26b   : > { %v1888_v38 = vadd.f32 %v4481_v3, %v1866_v20  ;;  %v892_v39 = vpop.f32.mrb[22].mxu1  ;;  %v1053_v40 = vpop.f32.mrb[38].mxu0  ;;  %3426 = vmatpush3.bf16.msra.mxu0 %v3425_v28 }
 0x26c   : > { %v1934_v45 = vmax.f32 %v1932_v43, %v1933_v31  ;;  %v1938_v46 = vmax.f32 %v1936_v48, %v1937_v36  ;;  %v1887_v47 = vadd.f32 %v4481_v3, %v1865_v34  ;;  %v1833_v49 = vrot.slane %v1053_v40, 2  ;;  %v894_v51 = vpop.f32.mrb[23].mxu1  ;;  %v4572_v52 = vpop.f32.mrb[39].mxu0  ;;  %3427 = vmatprep.subr.bf16.mxu0 %v3473_v26 }
 0x26d   : > { %v1904_v55 = vmax.f32 %v1888_v38, 0.0  ;;  %v1760_v57 = vrot.slane %v894_v51, 1 }
 0x26e   : > { %v1939_v58 = vrot.slane %v1938_v46, 2  ;;  %v1903_v60 = vmax.f32 %v1887_v47, 0.0  ;;  %v1834_v62 = vsel %vm1816_vm0, %v1832_v18, %v1833_v49  ;;  %v2696_v0 = vsel %vm2695_vm4, %v1934_v45, %v2694_v50 }
 0x26f   : > { %v1943_v2 = vsel %vm1816_vm0, %v1904_v55, -inf  ;;  %v1761_v5 = vsel %vm1743_vm2, %v1759_v56, %v1760_v57  ;;  %v1795_v6 = vadd.f32 %v1760_v57, %v892_v39  ;;  %v898_v9 = vpop.f32.mrb[24].mxu1  ;;  %v1059_v10 = vpop.f32.mrb[40].mxu0 }
 0x270   : > { %v1940_v16 = vmax.f32 %v1938_v46, %v1939_v58  ;;  %v1944_v17 = vmax.f32 %v1903_v60, %v1943_v2  ;;  %v1794_v22 = vadd.f32 %v1761_v5, %v886_v30  ;;  %v900_v23 = vpop.f32.mrb[25].mxu1  ;;  %v4584_v24 = vpop.f32.mrb[41].mxu0  ;;  %v1835_v54 = vrot.slane %v1059_v10, 2 }
 0x271   : > { %v1868_v27 = vadd.f32 %v1833_v49, %v1795_v6  ;;  %v1762_v31 = vrot.slane %v900_v23, 1 }
 0x272   : > { %v1941_v29 = vrot.slane %v1940_v16, 1  ;;  %v1945_v32 = vrot.slane %v1944_v17, 4  ;;  %v1867_v33 = vadd.f32 %v1834_v62, %v1794_v22  ;;  %v2774_v62 = vld [vmem:[%s4891_s4 + $0x110] sm:$0xff] }
 0x273   : > { %v1890_v50 = vadd.f32 %v4481_v3, %v1868_v27  ;;  %v904_v14 = vpop.f32.mrb[26].mxu1  ;;  %v1065_v21 = vpop.f32.mrb[42].mxu0 }
 0x274   : > { %v1942_v35 = vmax.f32 %v1940_v16, %v1941_v29  ;;  %v1946_v30 = vmax.f32 %v1944_v17, %v1945_v32  ;;  %v1889_v43 = vadd.f32 %v4481_v3, %v1867_v33  ;;  %v1836_v48 = vrot.slane %v1065_v21, 2  ;;  %v906_v59 = vpop.f32.mrb[27].mxu1  ;;  %v4589_v1 = vpop.f32.mrb[43].mxu0 }
 0x275   : > { %v1906_v20 = vmax.f32 %v1890_v50, 0.0  ;;  %v1763_v36 = vrot.slane %v906_v59, 1 }
 0x276   : > { %v1947_v34 = vrot.slane %v1946_v30, 2  ;;  %v1905_v38 = vmax.f32 %v1889_v43, 0.0  ;;  %v1837_v18 = vsel %vm1816_vm0, %v1835_v54, %v1836_v48  ;;  %v2698_v39 = vsel %vm2697_vm5, %v1942_v35, %v2696_v0  ;;  %v2775_v0 = vld [vmem:[%s4891_s4 + $0x118] sm:$0xff] }
 0x277   : > { %v1951_v40 = vsel %vm1816_vm0, %v1906_v20, -inf  ;;  %v1764_v45 = vsel %vm1743_vm2, %v1762_v31, %v1763_v36  ;;  %v1797_v46 = vadd.f32 %v1763_v36, %v904_v14  ;;  %v910_v47 = vpop.f32.mrb[28].mxu1  ;;  %v1071_v49 = vpop.f32.mrb[44].mxu0  ;;  %v3428_v10 = vpack.c.bf16 %v2775_v0, %v2774_v62  ;;  %v2776_v31 = vld [vmem:[%s4891_s4 + $0x120] sm:$0xff]  ;;  %v2777_v36 = vld [vmem:[%s4891_s4 + $0x128] sm:$0xff] }
 0x278   : > { %v1948_v51 = vmax.f32 %v1946_v30, %v1947_v34  ;;  %v1952_v55 = vmax.f32 %v1905_v38, %v1951_v40  ;;  %v1796_v56 = vadd.f32 %v1764_v45, %v898_v9  ;;  %v912_v57 = vpop.f32.mrb[29].mxu1  ;;  %v4596_v58 = vpop.f32.mrb[45].mxu0  ;;  %v1838_v15 = vrot.slane %v1071_v49, 2 }
 0x279   : > { %v1870_v60 = vadd.f32 %v1836_v48, %v1797_v46  ;;  %3429 = vmatpush3.bf16.msra.mxu0 %v3428_v10  ;;  %v1765_v33 = vrot.slane %v912_v57, 1  ;;  %v3431_v46 = vpack.c.bf16 %v2777_v36, %v2776_v31  ;;  %v2779_v36 = vld [vmem:[%s4891_s4 + $0x138] sm:$0xff] }
 0x27a   : > { %v1949_v2 = vrot.slane %v1948_v51, 1  ;;  %v1953_v5 = vrot.slane %v1952_v55, 4  ;;  %v1869_v6 = vadd.f32 %v1837_v18, %v1796_v56  ;;  %3430 = vmatprep.subr.bf16.mxu0 %v3473_v26  ;;  %v2192_v56 = vrot.slane %v4461_v42, 1 }
 0x27b   : > { %v1892_v11 = vadd.f32 %v4481_v3, %v1870_v60  ;;  %v916_v9 = vpop.f32.mrb[30].mxu1  ;;  %v1077_v16 = vpop.f32.mrb[46].mxu0 }
 0x27c   : > { %v1950_v17 = vmax.f32 %v1948_v51, %v1949_v2  ;;  %v1954_v22 = vmax.f32 %v1952_v55, %v1953_v5  ;;  %v1891_v23 = vadd.f32 %v4481_v3, %v1869_v6  ;;  %v1839_v27 = vrot.slane %v1077_v16, 2  ;;  %v918_v28 = vpop.f32.mrb[31].mxu1  ;;  %v4606_v29 = vpop.f32.mrb[47].mxu0 }
 0x27d   : > { %v1908_v32 = vmax.f32 %v1892_v11, 0.0  ;;  %v1766_v50 = vrot.slane %v918_v28, 1  ;;  %3432 = vmatpush3.bf16.msra.mxu0 %v3431_v46 }
 0x27e   : > { %v1955_v54 = vrot.slane %v1954_v22, 2  ;;  %v1907_v14 = vmax.f32 %v1891_v23, 0.0  ;;  %v1840_v21 = vsel %vm1816_vm0, %v1838_v15, %v1839_v27  ;;  %v2700_v35 = vsel %vm2699_vm6, %v1950_v17, %v2698_v39  ;;  %3433 = vmatprep.subr.bf16.mxu0 %v3473_v26 }
 0x27f   : > { %v1959_v30 = vsel %vm1816_vm0, %v1908_v32, -inf  ;;  %v1767_v43 = vsel %vm1743_vm2, %v1765_v33, %v1766_v50  ;;  %v1799_v48 = vadd.f32 %v1766_v50, %v916_v9  ;;  %v1148_v59 = vpop.f32.mrb[32].mxu1  ;;  %v1309_v20 = vpop.f32.mrb[48].mxu0 }
 0x280   : > { %v1956_v34 = vmax.f32 %v1954_v22, %v1955_v54  ;;  %v1960_v38 = vmax.f32 %v1907_v14, %v1959_v30  ;;  %v1798_v18 = vadd.f32 %v1767_v43, %v910_v47  ;;  %v1150_v40 = vpop.f32.mrb[33].mxu1  ;;  %v4619_v39 = vpop.f32.mrb[49].mxu0  ;;  %v1991_v60 = vrot.slane %v1148_v59, 1 }
 0x281   : > { %v1872_v45 = vadd.f32 %v1839_v27, %v1799_v48  ;;  %v2136_v62 = vrot.slane %v1309_v20, 3  ;;  %v2063_v42 = vrot.slane %v1150_v40, 2  ;;  %v4634_v48 = vrot.slane %v2192_v56, %v4456_v41 }
 0x282   : > { %v1957_v49 = vrot.slane %v1956_v34, 1  ;;  %v1961_v51 = vrot.slane %v1960_v38, 4  ;;  %v1871_v55 = vadd.f32 %v1840_v21, %v1798_v18 }
 0x283   : > { %v1894_v57 = vadd.f32 %v4481_v3, %v1872_v45  ;;  %v1154_v0 = vpop.f32.mrb[34].mxu1  ;;  %v1315_v2 = vpop.f32.mrb[50].mxu0 }
 0x284   : > { %v1962_v47 = vmax.f32 %v1960_v38, %v1961_v51  ;;  %v1893_v5 = vadd.f32 %v4481_v3, %v1871_v55  ;;  %v1992_v6 = vrot.slane %v1154_v0, 1  ;;  %v2137_v10 = vrot.slane %v1315_v2, 3  ;;  %v1156_v11 = vpop.f32.mrb[35].mxu1  ;;  %v4624_v15 = vpop.f32.mrb[51].mxu0 }
 0x285   : > { %v1910_v9 = vmax.f32 %v1894_v57, 0.0  ;;  %v2064_v16 = vrot.slane %v1156_v11, 2  ;;  %v1958_v17 = vmax.f32 %v1956_v34, %v1957_v49 }
 0x286   : > { %v1963_v22 = vrot.slane %v1962_v47, 2  ;;  %v1909_v23 = vmax.f32 %v1893_v5, 0.0  ;;  %v1993_v27 = vsel %vm1743_vm2, %v1991_v60, %v1992_v6  ;;  %v2032_v28 = vadd.f32 %v1992_v6, %v4469_v53 }
 0x287   : > { %v1967_v32 = vsel %vm1816_vm0, %v1910_v9, -inf  ;;  %v2031_v3 = vadd.f32 %v1993_v27, %v4448_v37  ;;  %v2138_v33 = vsel %vm2135_vm7, %v2136_v62, %v2137_v10  ;;  %v2065_v50 = vsel %vm1816_vm0, %v2063_v42, %v2064_v16  ;;  %v1160_v54 = vpop.f32.mrb[36].mxu1  ;;  %v1321_v14 = vpop.f32.mrb[52].mxu0  ;;  %v2778_v37 = vld [vmem:[%s4891_s4 + $0x130] sm:$0xff] }
 0x288   : > { %v1964_v21 = vmax.f32 %v1962_v47, %v1963_v22  ;;  %v1968_v30 = vmax.f32 %v1909_v23, %v1967_v32  ;;  %v2104_v43 = vadd.f32 %v2064_v16, %v2032_v28  ;;  %v1162_v59 = vpop.f32.mrb[37].mxu1  ;;  %v4636_v20 = vpop.f32.mrb[53].mxu0  ;;  %v2702_v31 = vsel %vm2701_vm8, %v1958_v17, %v2700_v35  ;;  %v2780_v32 = vld [vmem:[%s4891_s4 + $0x140] sm:$0xff] }
 0x289   : > { %v2103_v53 = vadd.f32 %v2065_v50, %v2031_v3  ;;  %v3434_v40 = vpack.c.bf16 %v2779_v36, %v2778_v37  ;;  %v1994_v46 = vrot.slane %v1160_v54, 1  ;;  %v2139_v49 = vrot.slane %v1321_v14, 3  ;;  %v2781_v3 = vld [vmem:[%s4891_s4 + $0x148] sm:$0xff] }
 0x28a   : > { %v1969_v34 = vrot.slane %v1968_v30, 4  ;;  %v2177_v38 = vadd.f32 %v2137_v10, %v2104_v43  ;;  %v1965_v18 = vrot.slane %v1964_v21, 1  ;;  %v2066_v47 = vrot.slane %v1162_v59, 2 }
 0x28b   : > { %v2176_v45 = vadd.f32 %v2138_v33, %v2103_v53  ;;  %v1166_v51 = vpop.f32.mrb[38].mxu1  ;;  %v1327_v55 = vpop.f32.mrb[54].mxu0  ;;  %3435 = vmatpush3.bf16.msra.mxu0 %v3434_v40  ;;  %v3437_v53 = vpack.c.bf16 %v2781_v3, %v2780_v32  ;;  %v2785_v32 = vld [vmem:[%s4891_s4 + $0x168] sm:$0xff] }
 0x28c   : > { %v1970_v56 = vmax.f32 %v1968_v30, %v1969_v34  ;;  %v2199_v35 = vadd.f32 %v4634_v48, %v2177_v38  ;;  %v1995_v57 = vrot.slane %v1166_v51, 1  ;;  %v2140_v60 = vrot.slane %v1327_v55, 3  ;;  %v1168_v62 = vpop.f32.mrb[39].mxu1  ;;  %v4646_v0 = vpop.f32.mrb[55].mxu0  ;;  %3436 = vmatprep.subr.bf16.mxu0 %v3473_v26 }
 0x28d   : > { %v2198_v2 = vadd.f32 %v4634_v48, %v2176_v45  ;;  %v2067_v5 = vrot.slane %v1168_v62, 2  ;;  %v1966_v6 = vmax.f32 %v1964_v21, %v1965_v18 }
 0x28e   : > { %v1971_v10 = vrot.slane %v1970_v56, 2  ;;  %v2215_v11 = vmax.f32 %v2199_v35, 0.0  ;;  %v1996_v9 = vsel %vm1743_vm2, %v1994_v46, %v1995_v57  ;;  %v2034_v42 = vadd.f32 %v1995_v57, %v4505_v63 }
 0x28f   : > { %v2214_v16 = vmax.f32 %v2198_v2, 0.0  ;;  %v2033_v17 = vadd.f32 %v1996_v9, %v4489_v13  ;;  %v2141_v22 = vsel %vm2135_vm7, %v2139_v49, %v2140_v60  ;;  %v2068_v23 = vsel %vm1816_vm0, %v2066_v47, %v2067_v5  ;;  %v1172_v27 = vpop.f32.mrb[40].mxu1  ;;  %v1333_v28 = vpop.f32.mrb[56].mxu0  ;;  %3438 = vmatpush3.bf16.msra.mxu0 %v3437_v53 }
 0x290   : > { %v2230_v33 = vsel %vm2135_vm7, %v2215_v11, -inf  ;;  %v2106_v63 = vadd.f32 %v2067_v5, %v2034_v42  ;;  %v1174_v50 = vpop.f32.mrb[41].mxu1  ;;  %v4662_v54 = vpop.f32.mrb[57].mxu0  ;;  %v1972_v21 = vmax.f32 %v1970_v56, %v1971_v10  ;;  %v1997_v43 = vrot.slane %v1172_v27, 1  ;;  %3439 = vmatprep.subr.bf16.mxu0 %v3473_v26 }
 0x291   : > { %v2231_v13 = vmax.f32 %v2214_v16, %v2230_v33  ;;  %v2105_v14 = vadd.f32 %v2068_v23, %v2033_v17  ;;  %v2704_v59 = vsel %vm2703_vm9, %v1966_v6, %v2702_v31  ;;  %v2142_v34 = vrot.slane %v1333_v28, 3  ;;  %v2782_v17 = vld [vmem:[%s4891_s4 + $0x150] sm:$0xff] }
 0x292   : > { %v2179_v30 = vadd.f32 %v2140_v60, %v2106_v63  ;;  %v1973_v40 = vrot.slane %v1972_v21, 1  ;;  %v2069_v46 = vrot.slane %v1174_v50, 2 }
 0x293   : > { %v2232_v37 = vrot.slane %v2231_v13, 4  ;;  %v2178_v36 = vadd.f32 %v2141_v22, %v2105_v14  ;;  %v1178_v38 = vpop.f32.mrb[42].mxu1  ;;  %v1339_v18 = vpop.f32.mrb[58].mxu0  ;;  %v2783_v22 = vld [vmem:[%s4891_s4 + $0x158] sm:$0xff] }
 0x294   : > { %v2201_v45 = vadd.f32 %v4634_v48, %v2179_v30  ;;  %v1998_v49 = vrot.slane %v1178_v38, 1  ;;  %v2143_v51 = vrot.slane %v1339_v18, 3  ;;  %v1180_v55 = vpop.f32.mrb[43].mxu1  ;;  %v4666_v35 = vpop.f32.mrb[59].mxu0  ;;  %v1974_v60 = vmax.f32 %v1972_v21, %v1973_v40 }
 0x295   : > { %v2233_v56 = vmax.f32 %v2231_v13, %v2232_v37  ;;  %v2200_v57 = vadd.f32 %v4634_v48, %v2178_v36  ;;  %v2070_v31 = vrot.slane %v1180_v55, 2  ;;  %v3440_v21 = vpack.c.bf16 %v2783_v22, %v2782_v17 }
 0x296   : > { %v2217_v62 = vmax.f32 %v2201_v45, 0.0  ;;  %v1999_v2 = vsel %vm1743_vm2, %v1997_v43, %v1998_v49  ;;  %v2036_v47 = vadd.f32 %v1998_v49, %v4538_v8  ;;  %v2144_v5 = vsel %vm2135_vm7, %v2142_v34, %v2143_v51 }
 0x297   : > { %v2234_v6 = vrot.slane %v2233_v56, 2  ;;  %v2216_v10 = vmax.f32 %v2200_v57, 0.0  ;;  %v2035_v11 = vadd.f32 %v1999_v2, %v4522_v44  ;;  %v2071_v9 = vsel %vm1816_vm0, %v2069_v46, %v2070_v31  ;;  %v1184_v42 = vpop.f32.mrb[44].mxu1  ;;  %v1345_v16 = vpop.f32.mrb[60].mxu0  ;;  %v2784_v44 = vld [vmem:[%s4891_s4 + $0x160] sm:$0xff]  ;;  %3441 = vmatpush3.bf16.msra.mxu0 %v3440_v21  ;;  %v2787_v57 = vld [vmem:[%s4891_s4 + $0x178] sm:$0xff] }
 0x298   : > { %v2238_v8 = vsel %vm2135_vm7, %v2217_v62, -inf  ;;  %v2108_v23 = vadd.f32 %v2070_v31, %v2036_v47  ;;  %v1186_v27 = vpop.f32.mrb[45].mxu1  ;;  %v4682_v28 = vpop.f32.mrb[61].mxu0  ;;  %v2000_v63 = vrot.slane %v1184_v42, 1  ;;  %v2145_v13 = vrot.slane %v1345_v16, 3  ;;  %3442 = vmatprep.subr.bf16.mxu0 %v3473_v26 }
 0x299   : > { %v2239_v3 = vmax.f32 %v2216_v10, %v2238_v8  ;;  %v2107_v33 = vadd.f32 %v2071_v9, %v2035_v11  ;;  %v4691_v14 = vsel %vm2705_vm10, %v1974_v60, %v2704_v59  ;;  %v4693_v30 = vmax.f32 %v2233_v56, %v2234_v6  ;;  %v2786_v56 = vld [vmem:[%s4891_s4 + $0x170] sm:$0xff] }
 0x29a   : > { %v2181_v50 = vadd.f32 %v2143_v51, %v2108_v23  ;;  %v3443_v34 = vpack.c.bf16 %v2785_v32, %v2784_v44  ;;  %v2072_v51 = vrot.slane %v1186_v27, 2  ;;  %v3446_v22 = vpack.c.bf16 %v2787_v57, %v2786_v56 }
 0x29b   : > { %v2240_v43 = vrot.slane %v2239_v3, 4  ;;  %v2180_v53 = vadd.f32 %v2144_v5, %v2107_v33  ;;  %v1190_v37 = vpop.f32.mrb[46].mxu1  ;;  %v1351_v36 = vpop.f32.mrb[62].mxu0  ;;  %v2236_v27 = vrot.slane %v4693_v30, 1 }
 0x29c   : > { %v2203_v38 = vadd.f32 %v4634_v48, %v2181_v50  ;;  %v2001_v18 = vrot.slane %v1190_v37, 1  ;;  %v2146_v40 = vrot.slane %v1351_v36, 3  ;;  %v1192_v45 = vpop.f32.mrb[47].mxu1  ;;  %v4696_v46 = vpop.f32.mrb[63].mxu0  ;;  %3444 = vmatpush3.bf16.msra.mxu0 %v3443_v34 }
 0x29d   : > { %v2241_v49 = vmax.f32 %v2239_v3, %v2240_v43  ;;  %v2202_v59 = vadd.f32 %v4634_v48, %v2180_v53  ;;  %v2073_v55 = vrot.slane %v1192_v45, 2  ;;  %3445 = vmatprep.subr.bf16.mxu0 %v3473_v26 }
 0x29e   : > { %v2219_v31 = vmax.f32 %v2203_v38, 0.0  ;;  %v2002_v60 = vsel %vm1743_vm2, %v2000_v63, %v2001_v18  ;;  %v2038_v62 = vadd.f32 %v2001_v18, %v4553_v19  ;;  %v2147_v2 = vsel %vm2135_vm7, %v2145_v13, %v2146_v40 }
 0x29f   : > { %v2242_v47 = vrot.slane %v2241_v49, 2  ;;  %v2218_v5 = vmax.f32 %v2202_v59, 0.0  ;;  %v2037_v6 = vadd.f32 %v2002_v60, %v4549_v4  ;;  %v2074_v10 = vsel %vm1816_vm0, %v2072_v51, %v2073_v55  ;;  %v1196_v11 = vpop.f32.mrb[48].mxu1  ;;  %v1357_v9 = vpop.f32.mrb[64].mxu0 }
 0x2a0   : > { %v2246_v42 = vsel %vm2135_vm7, %v2219_v31, -inf  ;;  %v2110_v16 = vadd.f32 %v2073_v55, %v2038_v62  ;;  %v1198_v17 = vpop.f32.mrb[49].mxu1  ;;  %v4713_v7 = vpop.f32.mrb[65].mxu0  ;;  %v2003_v44 = vrot.slane %v1196_v11, 1  ;;  %v2148_v63 = vrot.slane %v1357_v9, 3  ;;  %3447 = vmatpush3.bf16.msra.mxu0 %v3446_v22 }
 0x2a1   : > { %v2243_v8 = vmax.f32 %v2241_v49, %v2242_v47  ;;  %v2247_v19 = vmax.f32 %v2218_v5, %v2246_v42  ;;  %v2109_v23 = vadd.f32 %v2074_v10, %v2037_v6  ;;  %v2075_v43 = vrot.slane %v1198_v17, 2 }
 0x2a2   : > { %v2183_v4 = vadd.f32 %v2146_v40, %v2110_v16 }
 0x2a3   : > { %v2244_v32 = vrot.slane %v2243_v8, 1  ;;  %v2248_v3 = vrot.slane %v2247_v19, 4  ;;  %v2182_v33 = vadd.f32 %v2147_v2, %v2109_v23  ;;  %v1202_v50 = vpop.f32.mrb[50].mxu1  ;;  %v1363_v13 = vpop.f32.mrb[66].mxu0  ;;  %v2237_v2 = vmax.f32 %v4693_v30, %v2236_v27 }
 0x2a4   : > { %v2205_v21 = vadd.f32 %v4634_v48, %v2183_v4  ;;  %v2004_v53 = vrot.slane %v1202_v50, 1  ;;  %v2149_v37 = vrot.slane %v1363_v13, 3  ;;  %v1204_v36 = vpop.f32.mrb[51].mxu1  ;;  %v4718_v34 = vpop.f32.mrb[67].mxu0 }
 0x2a5   : > { %v2245_v26 = vmax.f32 %v2243_v8, %v2244_v32  ;;  %v2249_v38 = vmax.f32 %v2247_v19, %v2248_v3  ;;  %v2204_v18 = vadd.f32 %v4634_v48, %v2182_v33  ;;  %v2076_v40 = vrot.slane %v1204_v36, 2 }
 0x2a6   : > { %v2221_v45 = vmax.f32 %v2205_v21, 0.0  ;;  %v2005_v49 = vsel %vm1743_vm2, %v2003_v44, %v2004_v53  ;;  %v2040_v59 = vadd.f32 %v2004_v53, %v4562_v25  ;;  %v2150_v51 = vsel %vm2135_vm7, %v2148_v63, %v2149_v37 }
 0x2a7   : > { %v2250_v55 = vrot.slane %v2249_v38, 2  ;;  %v2220_v56 = vmax.f32 %v2204_v18, 0.0  ;;  %v2039_v57 = vadd.f32 %v2005_v49, %v4558_v61  ;;  %v2077_v31 = vsel %vm1816_vm0, %v2075_v43, %v2076_v40  ;;  %v1208_v60 = vpop.f32.mrb[52].mxu1  ;;  %v1369_v62 = vpop.f32.mrb[68].mxu0 }
 0x2a8   : > { %v2254_v47 = vsel %vm2135_vm7, %v2221_v45, -inf  ;;  %v2112_v5 = vadd.f32 %v2076_v40, %v2040_v59  ;;  %v1210_v6 = vpop.f32.mrb[53].mxu1  ;;  %v4728_v10 = vpop.f32.mrb[69].mxu0  ;;  %v2006_v16 = vrot.slane %v1208_v60, 1  ;;  %v2716_v17 = vsel %vm2693_vm3, %v2245_v26, %v2237_v2 }
 0x2a9   : > { %v2251_v11 = vmax.f32 %v2249_v38, %v2250_v55  ;;  %v2255_v25 = vmax.f32 %v2220_v56, %v2254_v47  ;;  %v2111_v9 = vadd.f32 %v2077_v31, %v2039_v57  ;;  %v2151_v19 = vrot.slane %v1369_v62, 3 }
 0x2aa   : > { %v2185_v42 = vadd.f32 %v2149_v37, %v2112_v5  ;;  %v2078_v27 = vrot.slane %v1210_v6, 2 }
 0x2ab   : > { %v2252_v61 = vrot.slane %v2251_v11, 1  ;;  %v2256_v22 = vrot.slane %v2255_v25, 4  ;;  %v2184_v8 = vadd.f32 %v2150_v51, %v2111_v9  ;;  %v1214_v23 = vpop.f32.mrb[54].mxu1  ;;  %v1375_v4 = vpop.f32.mrb[70].mxu0 }
 0x2ac   : > { %v2207_v30 = vadd.f32 %v4634_v48, %v2185_v42  ;;  %v2007_v44 = vrot.slane %v1214_v23, 1  ;;  %v2152_v32 = vrot.slane %v1375_v4, 3  ;;  %v1216_v3 = vpop.f32.mrb[55].mxu1  ;;  %v4732_v33 = vpop.f32.mrb[71].mxu0 }
 0x2ad   : > { %v2253_v63 = vmax.f32 %v2251_v11, %v2252_v61  ;;  %v2257_v50 = vmax.f32 %v2255_v25, %v2256_v22  ;;  %v2206_v13 = vadd.f32 %v4634_v48, %v2184_v8  ;;  %v2079_v21 = vrot.slane %v1216_v3, 2 }
 0x2ae   : > { %v2223_v43 = vmax.f32 %v2207_v30, 0.0  ;;  %v2008_v53 = vsel %vm1743_vm2, %v2006_v16, %v2007_v44  ;;  %v2042_v37 = vadd.f32 %v2007_v44, %v4572_v52  ;;  %v2153_v36 = vsel %vm2135_vm7, %v2151_v19, %v2152_v32 }
 0x2af   : > { %v2258_v26 = vrot.slane %v2257_v50, 2  ;;  %v2222_v38 = vmax.f32 %v2206_v13, 0.0  ;;  %v2041_v18 = vadd.f32 %v2008_v53, %v4568_v12  ;;  %v2080_v40 = vsel %vm1816_vm0, %v2078_v27, %v2079_v21  ;;  %v1220_v45 = vpop.f32.mrb[56].mxu1  ;;  %v1381_v49 = vpop.f32.mrb[72].mxu0 }
 0x2b0   : > { %v2262_v59 = vsel %vm2135_vm7, %v2223_v43, -inf  ;;  %v2114_v51 = vadd.f32 %v2079_v21, %v2042_v37  ;;  %v1222_v55 = vpop.f32.mrb[57].mxu1  ;;  %v4741_v56 = vpop.f32.mrb[73].mxu0  ;;  %v2009_v62 = vrot.slane %v1220_v45, 1  ;;  %v2717_v2 = vsel %vm2695_vm4, %v2253_v63, %v2716_v17 }
 0x2b1   : > { %v2259_v57 = vmax.f32 %v2257_v50, %v2258_v26  ;;  %v2263_v31 = vmax.f32 %v2222_v38, %v2262_v59  ;;  %v2113_v60 = vadd.f32 %v2080_v40, %v2041_v18  ;;  %v2154_v6 = vrot.slane %v1381_v49, 3 }
 0x2b2   : > { %v2187_v52 = vadd.f32 %v2152_v32, %v2114_v51  ;;  %v2081_v42 = vrot.slane %v1222_v55, 2 }
 0x2b3   : > { %v2260_v47 = vrot.slane %v2259_v57, 1  ;;  %v2264_v5 = vrot.slane %v2263_v31, 4  ;;  %v2186_v12 = vadd.f32 %v2153_v36, %v2113_v60  ;;  %v1226_v11 = vpop.f32.mrb[58].mxu1  ;;  %v1387_v25 = vpop.f32.mrb[74].mxu0 }
 0x2b4   : > { %v2209_v9 = vadd.f32 %v4634_v48, %v2187_v52  ;;  %v2010_v16 = vrot.slane %v1226_v11, 1  ;;  %v2155_v61 = vrot.slane %v1387_v25, 3  ;;  %v1228_v22 = vpop.f32.mrb[59].mxu1  ;;  %v4745_v8 = vpop.f32.mrb[75].mxu0 }
 0x2b5   : > { %v2265_v19 = vmax.f32 %v2263_v31, %v2264_v5  ;;  %v2208_v23 = vadd.f32 %v4634_v48, %v2186_v12  ;;  %v2082_v4 = vrot.slane %v1228_v22, 2  ;;  %v2261_v30 = vmax.f32 %v2259_v57, %v2260_v47 }
 0x2b6   : > { %v2225_v17 = vmax.f32 %v2209_v9, 0.0  ;;  %v2011_v27 = vsel %vm1743_vm2, %v2009_v62, %v2010_v16  ;;  %v2044_v44 = vadd.f32 %v2010_v16, %v4589_v1  ;;  %v2156_v32 = vsel %vm2135_vm7, %v2154_v6, %v2155_v61 }
 0x2b7   : > { %v2266_v3 = vrot.slane %v2265_v19, 2  ;;  %v2224_v63 = vmax.f32 %v2208_v23, 0.0  ;;  %v2043_v50 = vadd.f32 %v2011_v27, %v4584_v24  ;;  %v2083_v13 = vsel %vm1816_vm0, %v2081_v42, %v2082_v4  ;;  %v1232_v21 = vpop.f32.mrb[60].mxu1  ;;  %v1393_v43 = vpop.f32.mrb[76].mxu0 }
 0x2b8   : > { %v2270_v53 = vsel %vm2135_vm7, %v2225_v17, -inf  ;;  %v2116_v37 = vadd.f32 %v2082_v4, %v2044_v44  ;;  %v1234_v36 = vpop.f32.mrb[61].mxu1  ;;  %v4754_v26 = vpop.f32.mrb[77].mxu0  ;;  %v2012_v45 = vrot.slane %v1232_v21, 1  ;;  %v2718_v49 = vsel %vm2697_vm5, %v2261_v30, %v2717_v2 }
 0x2b9   : > { %v2267_v38 = vmax.f32 %v2265_v19, %v2266_v3  ;;  %v2271_v18 = vmax.f32 %v2224_v63, %v2270_v53  ;;  %v2115_v40 = vadd.f32 %v2083_v13, %v2043_v50  ;;  %v2157_v24 = vrot.slane %v1393_v43, 3 }
 0x2ba   : > { %v2189_v1 = vadd.f32 %v2155_v61, %v2116_v37  ;;  %v2084_v52 = vrot.slane %v1234_v36, 2 }
 0x2bb   : > { %v2272_v59 = vrot.slane %v2271_v18, 4  ;;  %v2188_v51 = vadd.f32 %v2156_v32, %v2115_v40  ;;  %v1238_v55 = vpop.f32.mrb[62].mxu1  ;;  %v1399_v57 = vpop.f32.mrb[78].mxu0  ;;  %v2268_v31 = vrot.slane %v2267_v38, 1 }
 0x2bc   : > { %v2211_v60 = vadd.f32 %v4634_v48, %v2189_v1  ;;  %v2013_v62 = vrot.slane %v1238_v55, 1  ;;  %v2158_v47 = vrot.slane %v1399_v57, 3  ;;  %v1240_v5 = vpop.f32.mrb[63].mxu1  ;;  %v4758_v12 = vpop.f32.mrb[79].mxu0 }
 0x2bd   : > { %v2273_v6 = vmax.f32 %v2271_v18, %v2272_v59  ;;  %v2210_v11 = vadd.f32 %v4634_v48, %v2188_v51  ;;  %v2085_v25 = vrot.slane %v1240_v5, 2  ;;  %v2269_v9 = vmax.f32 %v2267_v38, %v2268_v31 }
 0x2be   : > { %v2227_v2 = vmax.f32 %v2211_v60, 0.0  ;;  %v2014_v42 = vsel %vm1743_vm2, %v2012_v45, %v2013_v62  ;;  %v2046_v16 = vadd.f32 %v2013_v62, %v4606_v29  ;;  %v2159_v61 = vsel %vm2135_vm7, %v2157_v24, %v2158_v47  ;;  %v3462_v29 = vld [vmem:[%s4890_s3] sm:$0x7] }
 0x2bf   : > { %v2274_v22 = vrot.slane %v2273_v6, 2  ;;  %v2226_v19 = vmax.f32 %v2210_v11, 0.0  ;;  %v2045_v23 = vadd.f32 %v2014_v42, %v4596_v58  ;;  %v2086_v4 = vsel %vm1816_vm0, %v2084_v52, %v2085_v25  ;;  %v1470_v30 = vpop.f32.mrb[64].mxu1  ;;  %v1631_v17 = vpop.f32.mrb[80].mxu0 }
 0x2c0   : > { %v2278_v27 = vsel %vm2135_vm7, %v2227_v2, -inf  ;;  %v2118_v44 = vadd.f32 %v2085_v25, %v2046_v16  ;;  %v1472_v32 = vpop.f32.mrb[65].mxu1  ;;  %v1633_v3 = vpop.f32.mrb[81].mxu0  ;;  %v2310_v13 = vrot.slane %v1470_v30, 1  ;;  %v2583_v21 = vrot.slane %v3462_v29, 2 }
 0x2c1   : > { %v2279_v63 = vmax.f32 %v2226_v19, %v2278_v27  ;;  %v2117_v50 = vadd.f32 %v2086_v4, %v2045_v23  ;;  %v2454_v58 = vrot.slane %v1631_v17, 3  ;;  %v2275_v53 = vmax.f32 %v2273_v6, %v2274_v22 }
 0x2c2   : > { %v2191_v43 = vadd.f32 %v2158_v47, %v2118_v44  ;;  %v4771_v37 = vsel %vm2699_vm6, %v2269_v9, %v2718_v49  ;;  %v2382_v18 = vrot.slane %v1472_v32, 2  ;;  %v2527_v40 = vrot.slane %v1633_v3, 4 }
 0x2c3   : > { %v2280_v36 = vrot.slane %v2279_v63, 4  ;;  %v2190_v38 = vadd.f32 %v2159_v61, %v2117_v50  ;;  %v1476_v1 = vpop.f32.mrb[66].mxu1  ;;  %v1637_v45 = vpop.f32.mrb[82].mxu0  ;;  %v2276_v31 = vrot.slane %v2275_v53, 1 }
 0x2c4   : > { %v2213_v59 = vadd.f32 %v4634_v48, %v2191_v43  ;;  %v2311_v51 = vrot.slane %v1476_v1, 1  ;;  %v2455_v24 = vrot.slane %v1637_v45, 3  ;;  %v1478_v55 = vpop.f32.mrb[67].mxu1  ;;  %v1639_v57 = vpop.f32.mrb[83].mxu0 }
 0x2c5   : > { %v2281_v60 = vmax.f32 %v2279_v63, %v2280_v36  ;;  %v2212_v52 = vadd.f32 %v4634_v48, %v2190_v38  ;;  %v2383_v62 = vrot.slane %v1478_v55, 2  ;;  %v2528_v47 = vrot.slane %v1639_v57, 4 }
 0x2c6   : > { %v2229_v49 = vmax.f32 %v2213_v59, 0.0  ;;  %v2312_v5 = vsel %vm1743_vm2, %v2310_v13, %v2311_v51  ;;  %v2351_v6 = vadd.f32 %v2311_v51, %v4624_v15  ;;  %v2456_v11 = vsel %vm2135_vm7, %v2454_v58, %v2455_v24 }
 0x2c7   : > { %v2228_v25 = vmax.f32 %v2212_v52, 0.0  ;;  %v2350_v9 = vadd.f32 %v2312_v5, %v4619_v39  ;;  %v2384_v2 = vsel %vm1816_vm0, %v2382_v18, %v2383_v62  ;;  %v2529_v42 = vsel %vm2526_vm12, %v2527_v40, %v2528_v47  ;;  %v1482_v16 = vpop.f32.mrb[68].mxu1  ;;  %v1643_v61 = vpop.f32.mrb[84].mxu0 }
 0x2c8   : > { %v2286_v48 = vsel %vm2135_vm7, %v2229_v49, -inf  ;;  %v2423_v22 = vadd.f32 %v2383_v62, %v2351_v6  ;;  %v1484_v19 = vpop.f32.mrb[69].mxu1  ;;  %v1645_v23 = vpop.f32.mrb[85].mxu0  ;;  %v4783_v15 = vrot.slane %v2583_v21, %v4456_v41  ;;  %v2313_v17 = vrot.slane %v1482_v16, 1 }
 0x2c9   : > { %v2287_v4 = vmax.f32 %v2228_v25, %v2286_v48  ;;  %v2422_v30 = vadd.f32 %v2384_v2, %v2350_v9  ;;  %v2457_v44 = vrot.slane %v1643_v61, 3  ;;  %v2385_v39 = vrot.slane %v1484_v19, 2 }
 0x2ca   : > { %v2495_v27 = vadd.f32 %v2455_v24, %v2423_v22  ;;  %v2282_v32 = vrot.slane %v2281_v60, 2  ;;  %v2530_v50 = vrot.slane %v1645_v23, 4  ;;  %v2277_v43 = vmax.f32 %v2275_v53, %v2276_v31 }
 0x2cb   : > { %v2288_v3 = vrot.slane %v2287_v4, 4  ;;  %v2494_v63 = vadd.f32 %v2456_v11, %v2422_v30  ;;  %v1488_v13 = vpop.f32.mrb[70].mxu1  ;;  %v1649_v29 = vpop.f32.mrb[86].mxu0 }
 0x2cc   : > { %v2568_v58 = vadd.f32 %v2528_v47, %v2495_v27  ;;  %v2314_v36 = vrot.slane %v1488_v13, 1  ;;  %v2458_v38 = vrot.slane %v1649_v29, 3  ;;  %v1490_v18 = vpop.f32.mrb[71].mxu1  ;;  %v1651_v40 = vpop.f32.mrb[87].mxu0  ;;  %v2283_v1 = vmax.f32 %v2281_v60, %v2282_v32 }
 0x2cd   : > { %v2567_v45 = vadd.f32 %v2529_v42, %v2494_v63  ;;  %v2386_v41 = vrot.slane %v1490_v18, 2  ;;  %v2531_v21 = vrot.slane %v1651_v40, 4  ;;  %v4785_v59 = vmax.f32 %v2287_v4, %v2288_v3 }
 0x2ce   : > { %v2590_v51 = vadd.f32 %v4783_v15, %v2568_v58  ;;  %v2315_v24 = vsel %vm1743_vm2, %v2313_v17, %v2314_v36  ;;  %v2353_v55 = vadd.f32 %v2314_v36, %v4646_v0  ;;  %v2459_v57 = vsel %vm2135_vm7, %v2457_v44, %v2458_v38 }
 0x2cf   : > { %v2589_v53 = vadd.f32 %v4783_v15, %v2567_v45  ;;  %v2352_v31 = vadd.f32 %v2315_v24, %v4636_v20  ;;  %v2387_v52 = vsel %vm1816_vm0, %v2385_v39, %v2386_v41  ;;  %v2532_v60 = vsel %vm2526_vm12, %v2530_v50, %v2531_v21  ;;  %v1494_v62 = vpop.f32.mrb[72].mxu1  ;;  %v1655_v47 = vpop.f32.mrb[88].mxu0 }
 0x2d0   : > { %v2606_v49 = vmax.f32 %v2590_v51, 0.0  ;;  %v2425_v5 = vadd.f32 %v2386_v41, %v2353_v55  ;;  %v2316_v6 = vrot.slane %v1494_v62, 1  ;;  %v1496_v11 = vpop.f32.mrb[73].mxu1  ;;  %v1657_v25 = vpop.f32.mrb[89].mxu0  ;;  %v2460_v0 = vrot.slane %v1655_v47, 3 }
 0x2d1   : > { %v2605_v9 = vmax.f32 %v2589_v53, 0.0  ;;  %v2424_v2 = vadd.f32 %v2387_v52, %v2352_v31  ;;  %v2388_v42 = vrot.slane %v1496_v11, 2  ;;  %v2533_v48 = vrot.slane %v1657_v25, 4 }
 0x2d2   : > { %v2621_v16 = vsel %vm2526_vm12, %v2606_v49, -inf  ;;  %v2497_v61 = vadd.f32 %v2458_v38, %v2425_v5  ;;  %v2284_v20 = vrot.slane %v2283_v1, 1  ;;  %v2290_v30 = vrot.slane %v4785_v59, 2 }
 0x2d3   : > { %v2622_v22 = vmax.f32 %v2605_v9, %v2621_v16  ;;  %v2496_v19 = vadd.f32 %v2459_v57, %v2424_v2  ;;  %v1500_v23 = vpop.f32.mrb[74].mxu1  ;;  %v1661_v4 = vpop.f32.mrb[90].mxu0  ;;  %v2720_v17 = vsel %vm2701_vm8, %v2277_v43, %v4771_v37 }
 0x2d4   : > { %v2570_v27 = vadd.f32 %v2531_v21, %v2497_v61  ;;  %v2317_v44 = vrot.slane %v1500_v23, 1  ;;  %v2461_v39 = vrot.slane %v1661_v4, 3  ;;  %v1502_v32 = vpop.f32.mrb[75].mxu1  ;;  %v1663_v3 = vpop.f32.mrb[91].mxu0  ;;  %v2285_v63 = vmax.f32 %v2283_v1, %v2284_v20 }
 0x2d5   : > { %v2623_v50 = vrot.slane %v2622_v22, 4  ;;  %v2569_v13 = vadd.f32 %v2532_v60, %v2496_v19  ;;  %v2389_v29 = vrot.slane %v1502_v32, 2  ;;  %v2534_v58 = vrot.slane %v1663_v3, 4 }
 0x2d6   : > { %v2592_v36 = vadd.f32 %v4783_v15, %v2570_v27  ;;  %v2318_v38 = vsel %vm1743_vm2, %v2316_v6, %v2317_v44  ;;  %v2355_v18 = vadd.f32 %v2317_v44, %v4666_v35  ;;  %v2462_v40 = vsel %vm2135_vm7, %v2460_v0, %v2461_v39 }
 0x2d7   : > { %v2624_v45 = vmax.f32 %v2622_v22, %v2623_v50  ;;  %v2591_v37 = vadd.f32 %v4783_v15, %v2569_v13  ;;  %v2354_v43 = vadd.f32 %v2318_v38, %v4662_v54  ;;  %v2390_v41 = vsel %vm1816_vm0, %v2388_v42, %v2389_v29  ;;  %v1506_v1 = vpop.f32.mrb[76].mxu1  ;;  %v1667_v21 = vpop.f32.mrb[92].mxu0 }
 0x2d8   : > { %v2608_v51 = vmax.f32 %v2592_v36, 0.0  ;;  %v2427_v24 = vadd.f32 %v2389_v29, %v2355_v18  ;;  %v2535_v55 = vsel %vm2526_vm12, %v2533_v48, %v2534_v58  ;;  %v2319_v57 = vrot.slane %v1506_v1, 1  ;;  %v1508_v53 = vpop.f32.mrb[77].mxu1  ;;  %v1669_v31 = vpop.f32.mrb[93].mxu0 }
 0x2d9   : > { %v2625_v52 = vrot.slane %v2624_v45, 2  ;;  %v2607_v35 = vmax.f32 %v2591_v37, 0.0  ;;  %v2426_v60 = vadd.f32 %v2390_v41, %v2354_v43  ;;  %v2463_v62 = vrot.slane %v1667_v21, 3 }
 0x2da   : > { %v2629_v47 = vsel %vm2526_vm12, %v2608_v51, -inf  ;;  %v2499_v49 = vadd.f32 %v2461_v39, %v2427_v24  ;;  %v2391_v5 = vrot.slane %v1508_v53, 2  ;;  %v2536_v54 = vrot.slane %v1669_v31, 4 }
 0x2db   : > { %v2626_v6 = vmax.f32 %v2624_v45, %v2625_v52  ;;  %v2630_v11 = vmax.f32 %v2607_v35, %v2629_v47  ;;  %v2498_v25 = vadd.f32 %v2462_v40, %v2426_v60  ;;  %v2291_v9 = vmax.f32 %v4785_v59, %v2290_v30  ;;  %v1512_v2 = vpop.f32.mrb[78].mxu1  ;;  %v1673_v0 = vpop.f32.mrb[94].mxu0 }
 0x2dc   : > { %v2572_v42 = vadd.f32 %v2534_v58, %v2499_v49  ;;  %v2721_v16 = vsel %vm2703_vm9, %v2285_v63, %v2720_v17  ;;  %v2320_v61 = vrot.slane %v1512_v2, 1  ;;  %v2464_v48 = vrot.slane %v1673_v0, 3  ;;  %v1514_v20 = vpop.f32.mrb[79].mxu1  ;;  %v1675_v22 = vpop.f32.mrb[95].mxu0 }
 0x2dd   : > { %v2627_v19 = vrot.slane %v2626_v6, 1  ;;  %v2631_v23 = vrot.slane %v2630_v11, 4  ;;  %v2571_v4 = vadd.f32 %v2535_v55, %v2498_v25  ;;  %v2292_v27 = vrot.slane %v2291_v9, 1 }
 0x2de   : > { %v2594_v44 = vadd.f32 %v4783_v15, %v2572_v42  ;;  %v2321_v39 = vsel %vm1743_vm2, %v2319_v57, %v2320_v61  ;;  %v2357_v32 = vadd.f32 %v2320_v61, %v4696_v46  ;;  %v2465_v59 = vsel %vm2135_vm7, %v2463_v62, %v2464_v48 }
 0x2df   : > { %v4814_v30 = vmax.f32 %v2626_v6, %v2627_v19  ;;  %v2632_v3 = vmax.f32 %v2630_v11, %v2631_v23  ;;  %v2593_v17 = vadd.f32 %v4783_v15, %v2571_v4  ;;  %v2293_v63 = vmax.f32 %v2291_v9, %v2292_v27  ;;  %v1518_v50 = vpop.f32.mrb[80].mxu1  ;;  %v1679_v13 = vpop.f32.mrb[96].mxu0 }
 0x2e0   : > { %v2610_v29 = vmax.f32 %v2594_v44, 0.0  ;;  %v2356_v58 = vadd.f32 %v2321_v39, %v4682_v28  ;;  %v2392_v36 = vrot.slane %v1514_v20, 2  ;;  %v2537_v38 = vrot.slane %v1675_v22, 4  ;;  %v1520_v18 = vpop.f32.mrb[81].mxu1  ;;  %v1681_v40 = vpop.f32.mrb[97].mxu0 }
 0x2e1   : > { %v2633_v45 = vrot.slane %v2632_v3, 2  ;;  %v2609_v37 = vmax.f32 %v2593_v17, 0.0  ;;  %v2722_v46 = vsel %vm2705_vm10, %v2293_v63, %v2721_v16  ;;  %v2322_v43 = vrot.slane %v1518_v50, 1 }
 0x2e2   : > { %v2637_v41 = vsel %vm2526_vm12, %v2610_v29, -inf  ;;  %2859 = vmatprep.mubr.f32.mxu1 %v2722_v46  ;;  %v2393_v1 = vsel %vm1816_vm0, %v2391_v5, %v2392_v36  ;;  %v2429_v21 = vadd.f32 %v2392_v36, %v2357_v32  ;;  %v2538_v51 = vsel %vm2526_vm12, %v2536_v54, %v2537_v38 }
 0x2e3   : > { %v2634_v24 = vmax.f32 %v2632_v3, %v2633_v45  ;;  %v2638_v55 = vmax.f32 %v2609_v37, %v2637_v41  ;;  %2860 = vmatmul.mubr.f32.vlgmr.msra.gmra.mrb[96].mxu1 %v4691_v14  ;;  %v2428_v28 = vadd.f32 %v2393_v1, %v2356_v58  ;;  %v2466_v57 = vrot.slane %v1679_v13, 3  ;;  %v1524_v53 = vpop.f32.mrb[82].mxu1  ;;  %v1685_v31 = vpop.f32.mrb[98].mxu0 }
 0x2e4   : > { %v2501_v52 = vadd.f32 %v2464_v48, %v2429_v21  ;;  %v2394_v35 = vrot.slane %v1520_v18, 2  ;;  %v2539_v60 = vrot.slane %v1681_v40, 4  ;;  %v2323_v62 = vrot.slane %v1524_v53, 1  ;;  %v1526_v47 = vpop.f32.mrb[83].mxu1  ;;  %v1687_v49 = vpop.f32.mrb[99].mxu0 }
 0x2e5   : > { %v2635_v6 = vrot.slane %v2634_v24, 1  ;;  %v2639_v11 = vrot.slane %v2638_v55, 4  ;;  %v2500_v5 = vadd.f32 %v2465_v59, %v2428_v28  ;;  %v2467_v25 = vrot.slane %v1685_v31, 3 }
 0x2e6   : > { %v2574_v9 = vadd.f32 %v2537_v38, %v2501_v52  ;;  %v2324_v54 = vsel %vm1743_vm2, %v2322_v43, %v2323_v62  ;;  %v2359_v2 = vadd.f32 %v2323_v62, %v4718_v34  ;;  %v2395_v14 = vrot.slane %v1526_v47, 2 }
 0x2e7   : > { %v4825_v0 = vmax.f32 %v2634_v24, %v2635_v6  ;;  %v2640_v42 = vmax.f32 %v2638_v55, %v2639_v11  ;;  %v2573_v16 = vadd.f32 %v2538_v51, %v2500_v5  ;;  %v2358_v61 = vadd.f32 %v2324_v54, %v4713_v7  ;;  %v1530_v48 = vpop.f32.mrb[84].mxu1  ;;  %v1691_v20 = vpop.f32.mrb[100].mxu0 }
 0x2e8   : > { %v2596_v22 = vadd.f32 %v4783_v15, %v2574_v9  ;;  %v2468_v19 = vsel %vm2135_vm7, %v2466_v57, %v2467_v25  ;;  %v2396_v23 = vsel %vm1816_vm0, %v2394_v35, %v2395_v14  ;;  %v2431_v4 = vadd.f32 %v2395_v14, %v2359_v2  ;;  %v1532_v27 = vpop.f32.mrb[85].mxu1  ;;  %v1693_v44 = vpop.f32.mrb[101].mxu0 }
 0x2e9   : > { %v2641_v39 = vrot.slane %v2640_v42, 2  ;;  %v2595_v34 = vadd.f32 %v4783_v15, %v2573_v16  ;;  %v2430_v32 = vadd.f32 %v2396_v23, %v2358_v61  ;;  %v2540_v59 = vrot.slane %v1687_v49, 4 }
 0x2ea   : > { %v2612_v3 = vmax.f32 %v2596_v22, 0.0  ;;  %v2503_v17 = vadd.f32 %v2467_v25, %v2431_v4  ;;  %v2325_v63 = vrot.slane %v1530_v48, 1  ;;  %v2469_v7 = vrot.slane %v1691_v20, 3 }
 0x2eb   : > { %v2642_v50 = vmax.f32 %v2640_v42, %v2641_v39  ;;  %v2611_v13 = vmax.f32 %v2595_v34, 0.0  ;;  %v2502_v29 = vadd.f32 %v2468_v19, %v2430_v32  ;;  %v2541_v58 = vsel %vm2526_vm12, %v2539_v60, %v2540_v59  ;;  %v1536_v36 = vpop.f32.mrb[86].mxu1  ;;  %v1697_v38 = vpop.f32.mrb[102].mxu0 }
 0x2ec   : > { %v2645_v18 = vsel %vm2526_vm12, %v2612_v3, -inf  ;;  %v2576_v40 = vadd.f32 %v2540_v59, %v2503_v17  ;;  %v2397_v45 = vrot.slane %v1532_v27, 2  ;;  %v2542_v37 = vrot.slane %v1693_v44, 4  ;;  %v1538_v46 = vpop.f32.mrb[87].mxu1  ;;  %v1699_v43 = vpop.f32.mrb[103].mxu0 }
 0x2ed   : > { %v2643_v41 = vrot.slane %v2642_v50, 1  ;;  %v2646_v1 = vmax.f32 %v2611_v13, %v2645_v18  ;;  %v2575_v21 = vadd.f32 %v2541_v58, %v2502_v29  ;;  %v2326_v51 = vrot.slane %v1536_v36, 1 }
 0x2ee   : > { %v2598_v24 = vadd.f32 %v4783_v15, %v2576_v40  ;;  %v2470_v55 = vrot.slane %v1697_v38, 3  ;;  %v2398_v28 = vrot.slane %v1538_v46, 2  ;;  %v2543_v57 = vrot.slane %v1699_v43, 4 }
 0x2ef   : > { %v4835_v53 = vmax.f32 %v2642_v50, %v2643_v41  ;;  %v2647_v31 = vrot.slane %v2646_v1, 4  ;;  %v2597_v52 = vadd.f32 %v4783_v15, %v2575_v21  ;;  %v2327_v35 = vsel %vm1743_vm2, %v2325_v63, %v2326_v51  ;;  %v1542_v60 = vpop.f32.mrb[88].mxu1  ;;  %v1703_v62 = vpop.f32.mrb[104].mxu0 }
 0x2f0   : > { %v2614_v47 = vmax.f32 %v2598_v24, 0.0  ;;  %v2360_v49 = vadd.f32 %v2327_v35, %v4728_v10  ;;  %v2361_v6 = vadd.f32 %v2326_v51, %v4732_v33  ;;  %v2471_v11 = vsel %vm2135_vm7, %v2469_v7, %v2470_v55  ;;  %v1544_v5 = vpop.f32.mrb[89].mxu1  ;;  %v1705_v25 = vpop.f32.mrb[105].mxu0 }
 0x2f1   : > { %v2648_v9 = vmax.f32 %v2646_v1, %v2647_v31  ;;  %v2613_v54 = vmax.f32 %v2597_v52, 0.0  ;;  %v2399_v2 = vsel %vm1816_vm0, %v2397_v45, %v2398_v28  ;;  %v2544_v14 = vsel %vm2526_vm12, %v2542_v37, %v2543_v57 }
 0x2f2   : > { %v2653_v42 = vsel %vm2526_vm12, %v2614_v47, -inf  ;;  %v2432_v16 = vadd.f32 %v2399_v2, %v2360_v49  ;;  %v2433_v61 = vadd.f32 %v2398_v28, %v2361_v6  ;;  %v2328_v48 = vrot.slane %v1542_v60, 1 }
 0x2f3   : > { %v2649_v20 = vrot.slane %v2648_v9, 2  ;;  %v2654_v22 = vmax.f32 %v2613_v54, %v2653_v42  ;;  %v2472_v10 = vrot.slane %v1703_v62, 3  ;;  %v2400_v19 = vrot.slane %v1544_v5, 2  ;;  %v1548_v33 = vpop.f32.mrb[90].mxu1  ;;  %v1709_v23 = vpop.f32.mrb[106].mxu0 }
 0x2f4   : > { %v2504_v4 = vadd.f32 %v2471_v11, %v2432_v16  ;;  %v2505_v27 = vadd.f32 %v2470_v55, %v2433_v61  ;;  %v2545_v44 = vrot.slane %v1705_v25, 4  ;;  %v2329_v39 = vrot.slane %v1548_v33, 1  ;;  %v1550_v34 = vpop.f32.mrb[91].mxu1  ;;  %v1711_v32 = vpop.f32.mrb[107].mxu0 }
 0x2f5   : > { %v2650_v59 = vmax.f32 %v2648_v9, %v2649_v20  ;;  %v2655_v3 = vrot.slane %v2654_v22, 4  ;;  %v2473_v17 = vrot.slane %v1709_v23, 3  ;;  %v2401_v63 = vrot.slane %v1550_v34, 2 }
 0x2f6   : > { %v2577_v7 = vadd.f32 %v2544_v14, %v2504_v4  ;;  %v2578_v50 = vadd.f32 %v2543_v57, %v2505_v27  ;;  %v2330_v13 = vsel %vm1743_vm2, %v2328_v48, %v2329_v39  ;;  %v2363_v29 = vadd.f32 %v2329_v39, %v4745_v8 }
 0x2f7   : > { %v2651_v58 = vrot.slane %v2650_v59, 1  ;;  %v2656_v36 = vmax.f32 %v2654_v22, %v2655_v3  ;;  %v2362_v38 = vadd.f32 %v2330_v13, %v4741_v56  ;;  %v2474_v18 = vsel %vm2135_vm7, %v2472_v10, %v2473_v17  ;;  %v1554_v40 = vpop.f32.mrb[92].mxu1  ;;  %v1715_v45 = vpop.f32.mrb[108].mxu0 }
 0x2f8   : > { %v2599_v37 = vadd.f32 %v4783_v15, %v2577_v7  ;;  %v2600_v46 = vadd.f32 %v4783_v15, %v2578_v50  ;;  %v2402_v43 = vsel %vm1816_vm0, %v2400_v19, %v2401_v63  ;;  %v2435_v41 = vadd.f32 %v2401_v63, %v2363_v29  ;;  %v1556_v1 = vpop.f32.mrb[93].mxu1  ;;  %v1717_v21 = vpop.f32.mrb[109].mxu0 }
 0x2f9   : > { %v2652_v51 = vmax.f32 %v2650_v59, %v2651_v58  ;;  %v2657_v24 = vrot.slane %v2656_v36, 2  ;;  %v2434_v8 = vadd.f32 %v2402_v43, %v2362_v38  ;;  %v2546_v55 = vrot.slane %v1711_v32, 4 }
 0x2fa   : > { %v2615_v28 = vmax.f32 %v2599_v37, 0.0  ;;  %v2616_v57 = vmax.f32 %v2600_v46, 0.0  ;;  %v2507_v56 = vadd.f32 %v2473_v17, %v2435_v41  ;;  %v2331_v31 = vrot.slane %v1554_v40, 1 }
 0x2fb   : > { %v2658_v52 = vmax.f32 %v2656_v36, %v2657_v24  ;;  %v2506_v35 = vadd.f32 %v2474_v18, %v2434_v8  ;;  %v2547_v60 = vsel %vm2526_vm12, %v2545_v44, %v2546_v55  ;;  %v2475_v62 = vrot.slane %v1715_v45, 3  ;;  %v1560_v47 = vpop.f32.mrb[94].mxu1  ;;  %v1721_v49 = vpop.f32.mrb[110].mxu0 }
 0x2fc   : > { %v2661_v6 = vsel %vm2526_vm12, %v2616_v57, -inf  ;;  %v2580_v11 = vadd.f32 %v2546_v55, %v2507_v56  ;;  %v2403_v5 = vrot.slane %v1556_v1, 2  ;;  %v2548_v25 = vrot.slane %v1717_v21, 4  ;;  %v1562_v9 = vpop.f32.mrb[95].mxu1  ;;  %v1723_v54 = vpop.f32.mrb[111].mxu0 }
 0x2fd   : > { %v2659_v2 = vrot.slane %v2658_v52, 1  ;;  %v2662_v14 = vmax.f32 %v2615_v28, %v2661_v6  ;;  %v2579_v42 = vadd.f32 %v2547_v60, %v2506_v35  ;;  %v2332_v16 = vrot.slane %v1560_v47, 1 }
 0x2fe   : > { %v2602_v61 = vadd.f32 %v4783_v15, %v2580_v11  ;;  %v2476_v48 = vrot.slane %v1721_v49, 3  ;;  %v2404_v20 = vrot.slane %v1562_v9, 2  ;;  %v2549_v22 = vrot.slane %v1723_v54, 4 }
 0x2ff   : > { %v2660_v10 = vmax.f32 %v2658_v52, %v2659_v2  ;;  %v2663_v19 = vrot.slane %v2662_v14, 4  ;;  %v2601_v33 = vadd.f32 %v4783_v15, %v2579_v42  ;;  %v2333_v23 = vsel %vm1743_vm2, %v2331_v31, %v2332_v16 }
 0x300   : > { %v2618_v4 = vmax.f32 %v2602_v61, 0.0  ;;  %v2364_v27 = vadd.f32 %v2333_v23, %v4754_v26  ;;  %v2365_v44 = vadd.f32 %v2332_v16, %v4758_v12  ;;  %v2477_v39 = vsel %vm2135_vm7, %v2475_v62, %v2476_v48 }
 0x301   : > { %v2664_v34 = vmax.f32 %v2662_v14, %v2663_v19  ;;  %v2617_v32 = vmax.f32 %v2601_v33, 0.0  ;;  %v2405_v59 = vsel %vm1816_vm0, %v2403_v5, %v2404_v20  ;;  %v2550_v3 = vsel %vm2526_vm12, %v2548_v25, %v2549_v22  ;;  %v3030_v5 = vld [vmem:[%s4892_s5] ss:$0 sm:$0xff] }
 0x302   : > { %v2669_v17 = vsel %vm2526_vm12, %v2618_v4, -inf  ;;  %v2436_v63 = vadd.f32 %v2405_v59, %v2364_v27  ;;  %v2437_v7 = vadd.f32 %v2404_v20, %v2365_v44  ;;  %v2732_v50 = vsel %vm2693_vm3, %v4825_v0, %v4814_v30 }
 0x303   : > { %v2665_v13 = vrot.slane %v2664_v34, 2  ;;  %v2670_v26 = vmax.f32 %v2617_v32, %v2669_v17  ;;  %v2733_v12 = vsel %vm2695_vm4, %v4835_v53, %v2732_v50 }
 0x304   : > { %v2508_v29 = vadd.f32 %v2477_v39, %v2436_v63  ;;  %v2509_v58 = vadd.f32 %v2476_v48, %v2437_v7  ;;  %v2734_v36 = vsel %vm2697_vm5, %v2652_v51, %v2733_v12 }
 0x305   : > { %v2666_v38 = vmax.f32 %v2664_v34, %v2665_v13  ;;  %v2671_v18 = vrot.slane %v2670_v26, 4  ;;  %v2735_v40 = vsel %vm2699_vm6, %v2660_v10, %v2734_v36 }
 0x306   : > { %v2581_v45 = vadd.f32 %v2550_v3, %v2508_v29  ;;  %v2582_v37 = vadd.f32 %v2549_v22, %v2509_v58 }
 0x307   : > { %v2667_v46 = vrot.slane %v2666_v38, 1  ;;  %v2672_v43 = vmax.f32 %v2670_v26, %v2671_v18 }
 0x308   : > { %v2603_v41 = vadd.f32 %v4783_v15, %v2581_v45  ;;  %v2604_v30 = vadd.f32 %v4783_v15, %v2582_v37 }
 0x309   : > { %v2668_v0 = vmax.f32 %v2666_v38, %v2667_v46  ;;  %v2673_v1 = vrot.slane %v2672_v43, 2 }
 0x30a   : > { %v2619_v21 = vmax.f32 %v2603_v41, 0.0  ;;  %v2620_v53 = vmax.f32 %v2604_v30, 0.0 }
 0x30b   : > { %v2674_v24 = vmax.f32 %v2672_v43, %v2673_v1  ;;  %v2736_v8 = vsel %vm2701_vm8, %v2668_v0, %v2735_v40 }
 0x30c   : > { %v2677_v51 = vsel %vm2526_vm12, %v2620_v53, -inf }
 0x30d   : > { %v2675_v55 = vrot.slane %v2674_v24, 1  ;;  %v2678_v28 = vmax.f32 %v2619_v21, %v2677_v51 }
 0x30f   : > { %v2679_v57 = vrot.slane %v2678_v28, 4  ;;  %v2676_v56 = vmax.f32 %v2674_v24, %v2675_v55 }
 0x311   : > { %v2680_v31 = vmax.f32 %v2678_v28, %v2679_v57  ;;  %v2737_v52 = vsel %vm2703_vm9, %v2676_v56, %v2736_v8 }
 0x313   : > { %v2681_v35 = vrot.slane %v2680_v31, 2 }
 0x315   : > { %v2682_v15 = vmax.f32 %v2680_v31, %v2681_v35 }
 0x317   : > { %v2683_v60 = vrot.slane %v2682_v15, 1 }
 0x319   : > { %v2684_v62 = vmax.f32 %v2682_v15, %v2683_v60 }
 0x31b   : > { %v2738_v47 = vsel %vm2705_vm10, %v2684_v62, %v2737_v52 }
 0x31c   : > { %3182 = vmatmul.mubr.f32.vlgmr.msra.gmra.mrb[112].mxu0 %v2738_v47 }
 0x3b6   : > { %v3089_v49 = vpop.f32.mrb[96].mxu1 }
 0x3b7   : > { %v3090_v6 = vpop.f32.mrb[97].mxu1 }
 0x3b8   : > { %v3091_v11 = vadd.f32 %v3090_v6, %v3089_v49 }
 0x3ba   : > { %v2862_v25 = vadd.f32 %v3091_v11, %v3030_v5 }
 0x3ef   : > { %v2931_v9 = vpop.f32.mrb[112].mxu0 }
 0x3f0   : > { %v2932_v54 = vadd.f32 %v2931_v9, %v2862_v25  ;;  %v3183_v2 = vpop.f32.mrb[113].mxu0 }
 0x3f2   : > { %2936 = vst.msk [vmem:[%s251_s27] sm:$0xff] %vm2935_vm13, %v2932_v54 }
 0x3f3 PF: > { %s16_s21 = sadd.s32 1, %s3469_s21  }
 0x3f4   : > { %p13_p5 = scmp.ge.s32.totalorder %s16_s21, 4  }
 0x3f6   :  { %15 = sbr.rel (!%p13_p5) target bundleno = 1 (0x1), region = 74 }

</bundles_post_ra>
